<compile_context>
chip_gen: v6e
topology: v6e:2x2x1
jax: 0.10.0
libtpu: 0.0.40
codegen_flags: <defaults>
</compile_context>

<pallas_src>
import math
import functools

import jax
import jax.numpy as jnp
from jax.experimental import pallas as pl
from jax.experimental.pallas import tpu as pltpu


def _layernorm(x, gamma, beta, eps=1e-12):
    # TF-style LayerNorm (eps inside the sqrt), biased variance; rsqrt -> EUP.
    u = jnp.mean(x, axis=-1, keepdims=True)
    xc = x - u
    s = jnp.mean(xc * xc, axis=-1, keepdims=True)
    return gamma * (xc * jax.lax.rsqrt(s + eps)) + beta


def _gelu(x):
    # exact erf-based gelu, matching the reference implementation
    return x * 0.5 * (1.0 + jax.lax.erf(x * (1.0 / math.sqrt(2.0))))


def bert_layer_kernel(
    # inputs
    h_ref, m_ref,
    wqkv_ref, bqkv_ref, wo_ref, bo_ref, g1_ref, be1_ref,
    wi_ref, bi_ref, w2_ref, b2_ref, g2_ref, be2_ref,
    # output
    o_ref,
    # scratch
    attn_ref, attn_bf_ref, ctx_ref, acc_ref,
    *, num_heads, head_dim,
):
    f32 = jnp.float32
    bf16 = jnp.bfloat16
    S = h_ref.shape[1]
    Hs = num_heads * head_dim
    i_idx = pl.program_id(1)

    # ---- attention + first residual/LayerNorm: once per batch row (first I-tile step) ----
    @pl.when(i_idx == 0)
    def _attention():
        x = h_ref[0]                                # (S, H) f32
        x_bf = x.astype(bf16)
        mask = m_ref[...].reshape(1, S)             # additive key-axis mask -> broadcasts to (S, S)

        # Fused Q/K/V projection: one bf16 GEMM, f32 accumulation, one bias add.
        qkv = jnp.dot(x_bf, wqkv_ref[...], preferred_element_type=f32) + bqkv_ref[...]
        # Fold 1/sqrt(d) into Q once (S*H multiplies instead of num_heads*S*S).
        q_bf = (qkv[:, :Hs] * (1.0 / math.sqrt(head_dim))).astype(bf16)
        k_bf = qkv[:, Hs:2 * Hs].astype(bf16)
        v_bf = qkv[:, 2 * Hs:].astype(bf16)

        # Per-head scores/softmax/context; contexts are parked in a bf16 (S, H)
        # scratch so the output projection runs as a single full-depth GEMM.
        for h in range(num_heads):
            lo = h * head_dim
            qh = q_bf[:, lo:lo + head_dim]          # (S, D)
            kh = k_bf[:, lo:lo + head_dim]          # (S, D)
            vh = v_bf[:, lo:lo + head_dim]          # (S, D)

            # scores = qh @ kh^T without materializing a transpose.
            scores = jax.lax.dot_general(
                qh, kh, (((1,), (1,)), ((), ())), preferred_element_type=f32)  # (S, S)
            scores = scores + mask

            # numerically-stable softmax along the key axis (f32); divide on the EUP
            # (approx reciprocal -> probs sum to 1 within ~1e-3, fine for inference)
            m_max = jnp.max(scores, axis=-1, keepdims=True)
            e = jnp.exp(scores - m_max)
            denom = jnp.sum(e, axis=-1, keepdims=True)
            probs = e * pl.reciprocal(denom, approx=True)

            ctx_ref[:, lo:lo + head_dim] = jnp.dot(
                probs.astype(bf16), vh, preferred_element_type=f32).astype(bf16)

        # Single K=H output projection (full MXU depth) + BERTSelfOutput.
        attn = jnp.dot(ctx_ref[...], wo_ref[...], preferred_element_type=f32) + bo_ref[...]
        ln1 = _layernorm(attn + x, g1_ref[...], be1_ref[...])
        attn_ref[...] = ln1                          # f32 residual for the final LayerNorm
        attn_bf_ref[...] = ln1.astype(bf16)          # cached bf16 operand for every FFN tile
        acc_ref[...] = jnp.zeros_like(acc_ref)

    # ---- FFN: one intermediate-dim tile per grid step, accumulate into acc ----
    inter = jnp.dot(attn_bf_ref[...], wi_ref[...], preferred_element_type=f32) + bi_ref[...]
    inter = _gelu(inter)
    acc_ref[...] += jnp.dot(inter.astype(bf16), w2_ref[...], preferred_element_type=f32)

    # ---- BERTOutput: bias + residual + LayerNorm on the last I tile ----
    @pl.when(i_idx == pl.num_programs(1) - 1)
    def _finalize():
        out = acc_ref[...] + b2_ref[...]
        o_ref[0] = _layernorm(out + attn_ref[...], g2_ref[...], be2_ref[...]).astype(o_ref.dtype)


def prepare_params(params):
    """One-time parameter prep: fuse Q/K/V and cast GEMM weights to bf16.

    Call this once (e.g. at model load), not per forward call, so the casts /
    concatenates are not re-paid on every invocation.
    """
    bf16 = jnp.bfloat16
    return {
        "wqkv": jnp.concatenate(
            [params["wq"], params["wk"], params["wv"]], axis=1).astype(bf16),   # (H, 3H)
        "bqkv": jnp.concatenate(
            [params["bq"], params["bk"], params["bv"]], axis=1),                # (1, 3H) f32
        "wo": params["wo"].astype(bf16),
        "bo": params["bo"],
        "g1": params["g1"], "be1": params["be1"],
        "wi": params["wi"].astype(bf16),
        "bi": params["bi"],
        "w2": params["w2"].astype(bf16),
        "b2": params["b2"],
        "g2": params["g2"], "be2": params["be2"],
    }


def _choose_tile_i(I, H, vmem_limit_bytes):
    """Auto-pick the FFN intermediate tile.

    Prefer keeping both FFN weights fully resident (tile_i == I): that removes
    the reduction grid axis entirely, so wi/w2 are never re-streamed from HBM
    per batch row.  Otherwise pick the largest 256-aligned divisor (the v6e/v7x
    MXU is 256 wide; 128-wide tiles half-fill it and double grid-step overhead).
    """
    full_ffn_bytes = 2 * H * I * 2            # wi + w2 in bf16
    if 2 * full_ffn_bytes <= vmem_limit_bytes // 2:   # x2 headroom for double-buffering
        return I
    for cand in (1024, 512, 256):
        if I % cand == 0:
            return cand
    raise ValueError("intermediate_size must be a multiple of 256 to tile the FFN")


def bert_layer(hidden_states, attention_mask, prepared, *, num_heads,
               tile_i=None, vmem_limit_bytes=None):
    B, S, H = hidden_states.shape
    assert H % num_heads == 0
    head_dim = H // num_heads
    I = prepared["wi"].shape[1]

    # 48 MiB is safe under v7x's 64 MiB physical VMEM; raise to ~100 MiB on
    # v5e/v6e (128 MiB) so the auto-tiler keeps the full FFN resident.
    if vmem_limit_bytes is None:
        vmem_limit_bytes = 48 * 1024 * 1024

    if tile_i is None:
        tile_i = _choose_tile_i(I, H, vmem_limit_bytes)
    tile_i = min(tile_i, I)
    if tile_i < I:
        # Fail loudly rather than silently untiling (which could blow VMEM on v7x).
        assert I % tile_i == 0, f"tile_i={tile_i} must divide intermediate size {I}"
        assert tile_i % 256 == 0, f"tile_i={tile_i} must be a multiple of 256 (MXU width)"
    n_i = I // tile_i

    args = [
        hidden_states, attention_mask,
        prepared["wqkv"], prepared["bqkv"], prepared["wo"], prepared["bo"],
        prepared["g1"], prepared["be1"],
        prepared["wi"], prepared["bi"], prepared["w2"], prepared["b2"],
        prepared["g2"], prepared["be2"],
    ]

    def const_spec(arr):
        # whole-array block, identical across all grid steps (no re-DMA once resident)
        nd = arr.ndim
        return pl.BlockSpec(arr.shape, lambda b, k, _nd=nd: (0,) * _nd)

    in_specs = [
        pl.BlockSpec((1, S, H), lambda b, k: (b, 0, 0)),        # hidden_states
        pl.BlockSpec((1, 1, 1, S), lambda b, k: (b, 0, 0, 0)),  # attention_mask
        const_spec(prepared["wqkv"]), const_spec(prepared["bqkv"]),
        const_spec(prepared["wo"]), const_spec(prepared["bo"]),
        const_spec(prepared["g1"]), const_spec(prepared["be1"]),
        pl.BlockSpec((H, tile_i), lambda b, k: (0, k)),         # wi column tile
        pl.BlockSpec((1, tile_i), lambda b, k: (0, k)),         # bi tile
        pl.BlockSpec((tile_i, H), lambda b, k: (k, 0)),         # w2 row tile
        const_spec(prepared["b2"]),
        const_spec(prepared["g2"]), const_spec(prepared["be2"]),
    ]

    kernel = functools.partial(bert_layer_kernel, num_heads=num_heads, head_dim=head_dim)

    return pl.pallas_call(
        kernel,
        out_shape=jax.ShapeDtypeStruct((B, S, H), hidden_states.dtype),
        grid=(B, n_i),
        in_specs=in_specs,
        out_specs=pl.BlockSpec((1, S, H), lambda b, k: (b, 0, 0)),
        scratch_shapes=[
            pltpu.VMEM((S, H), jnp.float32),    # post-attention LayerNorm (f32 residual)
            pltpu.VMEM((S, H), jnp.bfloat16),   # cached bf16 copy for the FFN GEMMs
            pltpu.VMEM((S, H), jnp.bfloat16),   # per-head attention contexts (bf16)
            pltpu.VMEM((S, H), jnp.float32),    # FFN output accumulator
        ],
        compiler_params=pltpu.CompilerParams(
            # batch axis is "parallel": with B >= 2 it feeds both v7x TensorCores
            dimension_semantics=("parallel", "arbitrary"),
            vmem_limit_bytes=vmem_limit_bytes,
        ),
    )(*args)


def bert_layer_reference(hidden_states, attention_mask, params, *, num_heads):
    # Pure-JAX f32 reference matching the PyTorch module semantics.
    B, S, H = hidden_states.shape
    D = H // num_heads
    x = hidden_states

    def lin(v, w, b):
        return jnp.einsum("bsh,hi->bsi", v, w) + b

    def ln(t, g, b):
        u = jnp.mean(t, -1, keepdims=True)
        s = jnp.mean((t - u) ** 2, -1, keepdims=True)
        return g * (t - u) / jnp.sqrt(s + 1e-12) + b

    q = lin(x, params["wq"], params["bq"])
    k = lin(x, params["wk"], params["bk"])
    v = lin(x, params["wv"], params["bv"])

    def split(t):
        return t.reshape(B, S, num_heads, D).transpose(0, 2, 1, 3)

    qh, kh, vh = split(q), split(k), split(v)
    scores = jnp.einsum("bnqd,bnkd->bnqk", qh, kh) / math.sqrt(D)
    scores = scores + attention_mask
    probs = jax.nn.softmax(scores, axis=-1)
    ctx = jnp.einsum("bnqk,bnkd->bnqd", probs, vh)
    ctx = ctx.transpose(0, 2, 1, 3).reshape(B, S, H)

    attn = lin(ctx, params["wo"], params["bo"])
    attn_out = ln(attn + x, params["g1"], params["be1"])

    inter = lin(attn_out, params["wi"], params["bi"])
    inter = inter * 0.5 * (1.0 + jax.lax.erf(inter / math.sqrt(2.0)))
    out = jnp.einsum("bsi,ih->bsh", inter, params["w2"]) + params["b2"]
    return ln(out + attn_out, params["g2"], params["be2"])


def init_params(key, hidden_size, intermediate_size):
    ks = jax.random.split(key, 8)
    scale = 0.02
    H, I = hidden_size, intermediate_size
    return {
        "wq": scale * jax.random.normal(ks[0], (H, H), jnp.float32),
        "bq": jnp.zeros((1, H), jnp.float32),
        "wk": scale * jax.random.normal(ks[1], (H, H), jnp.float32),
        "bk": jnp.zeros((1, H), jnp.float32),
        "wv": scale * jax.random.normal(ks[2], (H, H), jnp.float32),
        "bv": jnp.zeros((1, H), jnp.float32),
        "wo": scale * jax.random.normal(ks[3], (H, H), jnp.float32),
        "bo": jnp.zeros((1, H), jnp.float32),
        "g1": jnp.ones((1, H), jnp.float32),
        "be1": jnp.zeros((1, H), jnp.float32),
        "wi": scale * jax.random.normal(ks[4], (H, I), jnp.float32),
        "bi": jnp.zeros((1, I), jnp.float32),
        "w2": scale * jax.random.normal(ks[5], (I, H), jnp.float32),
        "b2": jnp.zeros((1, H), jnp.float32),
        "g2": jnp.ones((1, H), jnp.float32),
        "be2": jnp.zeros((1, H), jnp.float32),
    }


if __name__ == "__main__":
    B, S, H = 2, 8, 32
    num_heads = 4
    intermediate = 32 * H           # 1024 -> with tile_i=512 two FFN tiles (exercises accumulation)

    key = jax.random.PRNGKey(0)
    k_h, k_m, k_p = jax.random.split(key, 3)

    hidden_states = jax.random.normal(k_h, (B, S, H), jnp.float32)
    # additive attention mask: 0 for attended positions, -10000 for masked ones
    keep = (jax.random.uniform(k_m, (B, 1, 1, S)) > 0.2).astype(jnp.float32)
    attention_mask = (1.0 - keep) * -10000.0

    params = init_params(k_p, H, intermediate)
    prepared = prepare_params(params)   # one-time: QKV fusion + bf16 weight cast

    # tile_i=512 forces the 2-step accumulation path at toy scale; production use
    # would leave tile_i=None (auto) so the full FFN stays resident when it fits.
    out = bert_layer(hidden_states, attention_mask, prepared,
                     num_heads=num_heads, tile_i=512)
    jax.block_until_ready(out)
    assert out.shape == (B, S, H)

    ref = bert_layer_reference(hidden_states, attention_mask, params, num_heads=num_heads)
    max_err = float(jnp.max(jnp.abs(out - ref)))
    assert max_err < 5e-2, f"mismatch vs reference: max|diff|={max_err}"

    print("KERNEL_OK")
</pallas_src>

<mosaic_0001>
module attributes {stable_mosaic.version = 11 : i64} {
  func.func @bert_layer_kernel(%arg0: i32, %arg1: i32, %arg2: memref<1x8x32xf32, #tpu.memory_space<vmem>>, %arg3: memref<1x1x1x8xf32, #tpu.memory_space<vmem>>, %arg4: memref<32x96xbf16, #tpu.memory_space<vmem>>, %arg5: memref<1x96xf32, #tpu.memory_space<vmem>>, %arg6: memref<32x32xbf16, #tpu.memory_space<vmem>>, %arg7: memref<1x32xf32, #tpu.memory_space<vmem>>, %arg8: memref<1x32xf32, #tpu.memory_space<vmem>>, %arg9: memref<1x32xf32, #tpu.memory_space<vmem>>, %arg10: memref<32x512xbf16, #tpu.memory_space<vmem>>, %arg11: memref<1x512xf32, #tpu.memory_space<vmem>>, %arg12: memref<512x32xbf16, #tpu.memory_space<vmem>>, %arg13: memref<1x32xf32, #tpu.memory_space<vmem>>, %arg14: memref<1x32xf32, #tpu.memory_space<vmem>>, %arg15: memref<1x32xf32, #tpu.memory_space<vmem>>, %arg16: memref<1x8x32xf32, #tpu.memory_space<vmem>>, %arg17: memref<8x32xf32, #tpu.memory_space<vmem>>, %arg18: memref<8x32xbf16, #tpu.memory_space<vmem>>, %arg19: memref<8x32xbf16, #tpu.memory_space<vmem>>, %arg20: memref<8x32xf32, #tpu.memory_space<vmem>>) attributes {dimension_semantics = [#tpu.dimension_semantics<parallel>, #tpu.dimension_semantics<arbitrary>], iteration_bounds = array<i64: 2, 2>, scalar_prefetch = 0 : i64, scratch_operands = 4 : i64, tpu.core_type = #tpu.core_type<tc>, window_params = [{transform_indices = @transform_0, window_bounds = array<i64: 1, 8, 32>}, {transform_indices = @transform_1, window_bounds = array<i64: 1, 1, 1, 8>}, {pipeline_mode = #tpu.pipeline_mode<synchronous>, transform_indices = @transform_2, window_bounds = array<i64: 32, 96>}, {pipeline_mode = #tpu.pipeline_mode<synchronous>, transform_indices = @transform_3, window_bounds = array<i64: 1, 96>}, {pipeline_mode = #tpu.pipeline_mode<synchronous>, transform_indices = @transform_4, window_bounds = array<i64: 32, 32>}, {pipeline_mode = #tpu.pipeline_mode<synchronous>, transform_indices = @transform_5, window_bounds = array<i64: 1, 32>}, {pipeline_mode = #tpu.pipeline_mode<synchronous>, transform_indices = @transform_6, window_bounds = array<i64: 1, 32>}, {pipeline_mode = #tpu.pipeline_mode<synchronous>, transform_indices = @transform_7, window_bounds = array<i64: 1, 32>}, {transform_indices = @transform_8, window_bounds = array<i64: 32, 512>}, {transform_indices = @transform_9, window_bounds = array<i64: 1, 512>}, {transform_indices = @transform_10, window_bounds = array<i64: 512, 32>}, {pipeline_mode = #tpu.pipeline_mode<synchronous>, transform_indices = @transform_11, window_bounds = array<i64: 1, 32>}, {pipeline_mode = #tpu.pipeline_mode<synchronous>, transform_indices = @transform_12, window_bounds = array<i64: 1, 32>}, {pipeline_mode = #tpu.pipeline_mode<synchronous>, transform_indices = @transform_13, window_bounds = array<i64: 1, 32>}, {transform_indices = @transform_14, window_bounds = array<i64: 1, 8, 32>}]} {
    %c0_i32 = arith.constant 0 : i32
    %0 = arith.cmpi eq, %arg1, %c0_i32 : i32
    %1 = arith.extui %0 : i1 to i32
    %c0_i32_0 = arith.constant 0 : i32
    %2 = arith.cmpi ne, %1, %c0_i32_0 : i32
    scf.if %2 {
      %c0_17 = arith.constant 0 : index
      %c0_18 = arith.constant 0 : index
      %c0_19 = arith.constant 0 : index
      %26 = vector.load %arg2[%c0_17, %c0_18, %c0_19] : memref<1x8x32xf32, #tpu.memory_space<vmem>>, vector<1x8x32xf32>
      %27 = vector.shape_cast %26 : vector<1x8x32xf32> to vector<8x32xf32>
      %28 = arith.truncf %27 : vector<8x32xf32> to vector<8x32xbf16>
      %c0_20 = arith.constant 0 : index
      %c0_21 = arith.constant 0 : index
      %c0_22 = arith.constant 0 : index
      %c0_23 = arith.constant 0 : index
      %29 = vector.load %arg3[%c0_20, %c0_21, %c0_22, %c0_23] : memref<1x1x1x8xf32, #tpu.memory_space<vmem>>, vector<1x1x1x8xf32>
      %30 = vector.shape_cast %29 : vector<1x1x1x8xf32> to vector<1x8xf32>
      %c0_24 = arith.constant 0 : index
      %c0_25 = arith.constant 0 : index
      %31 = vector.load %arg4[%c0_24, %c0_25] : memref<32x96xbf16, #tpu.memory_space<vmem>>, vector<32x96xbf16>
      %cst_26 = arith.constant dense<0.000000e+00> : vector<8x96xf32>
      %32 = tpu.matmul %28, %31, %cst_26 {dimension_numbers = #tpu.dot_dimension_numbers<[1], [0], [0], [1], [0, 0, 1, 1], [], []>} : vector<8x32xbf16>, vector<32x96xbf16>, vector<8x96xf32> -> vector<8x96xf32>
      %c0_27 = arith.constant 0 : index
      %c0_28 = arith.constant 0 : index
      %33 = vector.load %arg5[%c0_27, %c0_28] : memref<1x96xf32, #tpu.memory_space<vmem>>, vector<1x96xf32>
      %34 = vector.broadcast %33 : vector<1x96xf32> to vector<8x96xf32>
      %35 = arith.addf %32, %34 : vector<8x96xf32>
      %36 = vector.extract_strided_slice %35 {offsets = [0, 0], sizes = [8, 32], strides = [1, 1]} : vector<8x96xf32> to vector<8x32xf32>
      %cst_29 = arith.constant 0.353553385 : f32
      %37 = vector.broadcast %cst_29 : f32 to vector<8x32xf32>
      %38 = arith.mulf %36, %37 : vector<8x32xf32>
      %39 = arith.truncf %38 : vector<8x32xf32> to vector<8x32xbf16>
      %40 = vector.extract_strided_slice %35 {offsets = [0, 32], sizes = [8, 32], strides = [1, 1]} : vector<8x96xf32> to vector<8x32xf32>
      %41 = arith.truncf %40 : vector<8x32xf32> to vector<8x32xbf16>
      %42 = vector.extract_strided_slice %35 {offsets = [0, 64], sizes = [8, 32], strides = [1, 1]} : vector<8x96xf32> to vector<8x32xf32>
      %43 = arith.truncf %42 : vector<8x32xf32> to vector<8x32xbf16>
      %44 = vector.extract_strided_slice %39 {offsets = [0, 0], sizes = [8, 8], strides = [1, 1]} : vector<8x32xbf16> to vector<8x8xbf16>
      %45 = vector.extract_strided_slice %41 {offsets = [0, 0], sizes = [8, 8], strides = [1, 1]} : vector<8x32xbf16> to vector<8x8xbf16>
      %46 = vector.extract_strided_slice %43 {offsets = [0, 0], sizes = [8, 8], strides = [1, 1]} : vector<8x32xbf16> to vector<8x8xbf16>
      %cst_30 = arith.constant dense<0.000000e+00> : vector<8x8xf32>
      %47 = tpu.matmul %44, %45, %cst_30 {dimension_numbers = #tpu.dot_dimension_numbers<[1], [1], [0], [0], [0, 0, 1, 0], [], []>} : vector<8x8xbf16>, vector<8x8xbf16>, vector<8x8xf32> -> vector<8x8xf32>
      %48 = vector.broadcast %30 : vector<1x8xf32> to vector<8x8xf32>
      %49 = arith.addf %47, %48 : vector<8x8xf32>
      %cst_31 = arith.constant dense<0xFF800000> : vector<8xf32>
      %50 = vector.multi_reduction <maximumf>, %49, %cst_31 [1] : vector<8x8xf32> to vector<8xf32>
      %51 = vector.shape_cast %50 : vector<8xf32> to vector<8x1xf32>
      %52 = vector.broadcast %51 : vector<8x1xf32> to vector<8x8xf32>
      %53 = arith.subf %49, %52 : vector<8x8xf32>
      %54 = math.exp %53 : vector<8x8xf32>
      %cst_32 = arith.constant dense<0.000000e+00> : vector<8xf32>
      %55 = vector.multi_reduction <add>, %54, %cst_32 [1] : vector<8x8xf32> to vector<8xf32>
      %56 = vector.shape_cast %55 : vector<8xf32> to vector<8x1xf32>
      %57 = tpu.reciprocal %56 {approx = true} : vector<8x1xf32> -> vector<8x1xf32>
      %58 = vector.broadcast %57 : vector<8x1xf32> to vector<8x8xf32>
      %59 = arith.mulf %54, %58 : vector<8x8xf32>
      %60 = arith.truncf %59 : vector<8x8xf32> to vector<8x8xbf16>
      %cst_33 = arith.constant dense<0.000000e+00> : vector<8x8xf32>
      %61 = tpu.matmul %60, %46, %cst_33 {dimension_numbers = #tpu.dot_dimension_numbers<[1], [0], [0], [1], [0, 0, 1, 1], [], []>} : vector<8x8xbf16>, vector<8x8xbf16>, vector<8x8xf32> -> vector<8x8xf32>
      %62 = arith.truncf %61 : vector<8x8xf32> to vector<8x8xbf16>
      %c0_34 = arith.constant 0 : index
      %c0_35 = arith.constant 0 : index
      %63 = vector.load %arg19[%c0_34, %c0_35] : memref<8x32xbf16, #tpu.memory_space<vmem>>, vector<8x8xbf16>
      tpu.vector_store %arg19[%c0_34, %c0_35], %62 {strides = array<i32>} : memref<8x32xbf16, #tpu.memory_space<vmem>>, vector<8x8xbf16>,
      %64 = vector.extract_strided_slice %39 {offsets = [0, 8], sizes = [8, 8], strides = [1, 1]} : vector<8x32xbf16> to vector<8x8xbf16>
      %65 = vector.extract_strided_slice %41 {offsets = [0, 8], sizes = [8, 8], strides = [1, 1]} : vector<8x32xbf16> to vector<8x8xbf16>
      %66 = vector.extract_strided_slice %43 {offsets = [0, 8], sizes = [8, 8], strides = [1, 1]} : vector<8x32xbf16> to vector<8x8xbf16>
      %cst_36 = arith.constant dense<0.000000e+00> : vector<8x8xf32>
      %67 = tpu.matmul %64, %65, %cst_36 {dimension_numbers = #tpu.dot_dimension_numbers<[1], [1], [0], [0], [0, 0, 1, 0], [], []>} : vector<8x8xbf16>, vector<8x8xbf16>, vector<8x8xf32> -> vector<8x8xf32>
      %68 = vector.broadcast %30 : vector<1x8xf32> to vector<8x8xf32>
      %69 = arith.addf %67, %68 : vector<8x8xf32>
      %cst_37 = arith.constant dense<0xFF800000> : vector<8xf32>
      %70 = vector.multi_reduction <maximumf>, %69, %cst_37 [1] : vector<8x8xf32> to vector<8xf32>
      %71 = vector.shape_cast %70 : vector<8xf32> to vector<8x1xf32>
      %72 = vector.broadcast %71 : vector<8x1xf32> to vector<8x8xf32>
      %73 = arith.subf %69, %72 : vector<8x8xf32>
      %74 = math.exp %73 : vector<8x8xf32>
      %cst_38 = arith.constant dense<0.000000e+00> : vector<8xf32>
      %75 = vector.multi_reduction <add>, %74, %cst_38 [1] : vector<8x8xf32> to vector<8xf32>
      %76 = vector.shape_cast %75 : vector<8xf32> to vector<8x1xf32>
      %77 = tpu.reciprocal %76 {approx = true} : vector<8x1xf32> -> vector<8x1xf32>
      %78 = vector.broadcast %77 : vector<8x1xf32> to vector<8x8xf32>
      %79 = arith.mulf %74, %78 : vector<8x8xf32>
      %80 = arith.truncf %79 : vector<8x8xf32> to vector<8x8xbf16>
      %cst_39 = arith.constant dense<0.000000e+00> : vector<8x8xf32>
      %81 = tpu.matmul %80, %66, %cst_39 {dimension_numbers = #tpu.dot_dimension_numbers<[1], [0], [0], [1], [0, 0, 1, 1], [], []>} : vector<8x8xbf16>, vector<8x8xbf16>, vector<8x8xf32> -> vector<8x8xf32>
      %82 = arith.truncf %81 : vector<8x8xf32> to vector<8x8xbf16>
      %c0_40 = arith.constant 0 : index
      %c8 = arith.constant 8 : index
      %83 = vector.load %arg19[%c0_40, %c8] : memref<8x32xbf16, #tpu.memory_space<vmem>>, vector<8x8xbf16>
      tpu.vector_store %arg19[%c0_40, %c8], %82 {strides = array<i32>} : memref<8x32xbf16, #tpu.memory_space<vmem>>, vector<8x8xbf16>,
      %84 = vector.extract_strided_slice %39 {offsets = [0, 16], sizes = [8, 8], strides = [1, 1]} : vector<8x32xbf16> to vector<8x8xbf16>
      %85 = vector.extract_strided_slice %41 {offsets = [0, 16], sizes = [8, 8], strides = [1, 1]} : vector<8x32xbf16> to vector<8x8xbf16>
      %86 = vector.extract_strided_slice %43 {offsets = [0, 16], sizes = [8, 8], strides = [1, 1]} : vector<8x32xbf16> to vector<8x8xbf16>
      %cst_41 = arith.constant dense<0.000000e+00> : vector<8x8xf32>
      %87 = tpu.matmul %84, %85, %cst_41 {dimension_numbers = #tpu.dot_dimension_numbers<[1], [1], [0], [0], [0, 0, 1, 0], [], []>} : vector<8x8xbf16>, vector<8x8xbf16>, vector<8x8xf32> -> vector<8x8xf32>
      %88 = vector.broadcast %30 : vector<1x8xf32> to vector<8x8xf32>
      %89 = arith.addf %87, %88 : vector<8x8xf32>
      %cst_42 = arith.constant dense<0xFF800000> : vector<8xf32>
      %90 = vector.multi_reduction <maximumf>, %89, %cst_42 [1] : vector<8x8xf32> to vector<8xf32>
      %91 = vector.shape_cast %90 : vector<8xf32> to vector<8x1xf32>
      %92 = vector.broadcast %91 : vector<8x1xf32> to vector<8x8xf32>
      %93 = arith.subf %89, %92 : vector<8x8xf32>
      %94 = math.exp %93 : vector<8x8xf32>
      %cst_43 = arith.constant dense<0.000000e+00> : vector<8xf32>
      %95 = vector.multi_reduction <add>, %94, %cst_43 [1] : vector<8x8xf32> to vector<8xf32>
      %96 = vector.shape_cast %95 : vector<8xf32> to vector<8x1xf32>
      %97 = tpu.reciprocal %96 {approx = true} : vector<8x1xf32> -> vector<8x1xf32>
      %98 = vector.broadcast %97 : vector<8x1xf32> to vector<8x8xf32>
      %99 = arith.mulf %94, %98 : vector<8x8xf32>
      %100 = arith.truncf %99 : vector<8x8xf32> to vector<8x8xbf16>
      %cst_44 = arith.constant dense<0.000000e+00> : vector<8x8xf32>
      %101 = tpu.matmul %100, %86, %cst_44 {dimension_numbers = #tpu.dot_dimension_numbers<[1], [0], [0], [1], [0, 0, 1, 1], [], []>} : vector<8x8xbf16>, vector<8x8xbf16>, vector<8x8xf32> -> vector<8x8xf32>
      %102 = arith.truncf %101 : vector<8x8xf32> to vector<8x8xbf16>
      %c0_45 = arith.constant 0 : index
      %c16 = arith.constant 16 : index
      %103 = vector.load %arg19[%c0_45, %c16] : memref<8x32xbf16, #tpu.memory_space<vmem>>, vector<8x8xbf16>
      tpu.vector_store %arg19[%c0_45, %c16], %102 {strides = array<i32>} : memref<8x32xbf16, #tpu.memory_space<vmem>>, vector<8x8xbf16>,
      %104 = vector.extract_strided_slice %39 {offsets = [0, 24], sizes = [8, 8], strides = [1, 1]} : vector<8x32xbf16> to vector<8x8xbf16>
      %105 = vector.extract_strided_slice %41 {offsets = [0, 24], sizes = [8, 8], strides = [1, 1]} : vector<8x32xbf16> to vector<8x8xbf16>
      %106 = vector.extract_strided_slice %43 {offsets = [0, 24], sizes = [8, 8], strides = [1, 1]} : vector<8x32xbf16> to vector<8x8xbf16>
      %cst_46 = arith.constant dense<0.000000e+00> : vector<8x8xf32>
      %107 = tpu.matmul %104, %105, %cst_46 {dimension_numbers = #tpu.dot_dimension_numbers<[1], [1], [0], [0], [0, 0, 1, 0], [], []>} : vector<8x8xbf16>, vector<8x8xbf16>, vector<8x8xf32> -> vector<8x8xf32>
      %108 = vector.broadcast %30 : vector<1x8xf32> to vector<8x8xf32>
      %109 = arith.addf %107, %108 : vector<8x8xf32>
      %cst_47 = arith.constant dense<0xFF800000> : vector<8xf32>
      %110 = vector.multi_reduction <maximumf>, %109, %cst_47 [1] : vector<8x8xf32> to vector<8xf32>
      %111 = vector.shape_cast %110 : vector<8xf32> to vector<8x1xf32>
      %112 = vector.broadcast %111 : vector<8x1xf32> to vector<8x8xf32>
      %113 = arith.subf %109, %112 : vector<8x8xf32>
      %114 = math.exp %113 : vector<8x8xf32>
      %cst_48 = arith.constant dense<0.000000e+00> : vector<8xf32>
      %115 = vector.multi_reduction <add>, %114, %cst_48 [1] : vector<8x8xf32> to vector<8xf32>
      %116 = vector.shape_cast %115 : vector<8xf32> to vector<8x1xf32>
      %117 = tpu.reciprocal %116 {approx = true} : vector<8x1xf32> -> vector<8x1xf32>
      %118 = vector.broadcast %117 : vector<8x1xf32> to vector<8x8xf32>
      %119 = arith.mulf %114, %118 : vector<8x8xf32>
      %120 = arith.truncf %119 : vector<8x8xf32> to vector<8x8xbf16>
      %cst_49 = arith.constant dense<0.000000e+00> : vector<8x8xf32>
      %121 = tpu.matmul %120, %106, %cst_49 {dimension_numbers = #tpu.dot_dimension_numbers<[1], [0], [0], [1], [0, 0, 1, 1], [], []>} : vector<8x8xbf16>, vector<8x8xbf16>, vector<8x8xf32> -> vector<8x8xf32>
      %122 = arith.truncf %121 : vector<8x8xf32> to vector<8x8xbf16>
      %c0_50 = arith.constant 0 : index
      %c24 = arith.constant 24 : index
      %123 = vector.load %arg19[%c0_50, %c24] : memref<8x32xbf16, #tpu.memory_space<vmem>>, vector<8x8xbf16>
      tpu.vector_store %arg19[%c0_50, %c24], %122 {strides = array<i32>} : memref<8x32xbf16, #tpu.memory_space<vmem>>, vector<8x8xbf16>,
      %c0_51 = arith.constant 0 : index
      %c0_52 = arith.constant 0 : index
      %124 = vector.load %arg19[%c0_51, %c0_52] : memref<8x32xbf16, #tpu.memory_space<vmem>>, vector<8x32xbf16>
      %c0_53 = arith.constant 0 : index
      %c0_54 = arith.constant 0 : index
      %125 = vector.load %arg6[%c0_53, %c0_54] : memref<32x32xbf16, #tpu.memory_space<vmem>>, vector<32x32xbf16>
      %cst_55 = arith.constant dense<0.000000e+00> : vector<8x32xf32>
      %126 = tpu.matmul %124, %125, %cst_55 {dimension_numbers = #tpu.dot_dimension_numbers<[1], [0], [0], [1], [0, 0, 1, 1], [], []>} : vector<8x32xbf16>, vector<32x32xbf16>, vector<8x32xf32> -> vector<8x32xf32>
      %c0_56 = arith.constant 0 : index
      %c0_57 = arith.constant 0 : index
      %127 = vector.load %arg7[%c0_56, %c0_57] : memref<1x32xf32, #tpu.memory_space<vmem>>, vector<1x32xf32>
      %128 = vector.broadcast %127 : vector<1x32xf32> to vector<8x32xf32>
      %129 = arith.addf %126, %128 : vector<8x32xf32>
      %130 = arith.addf %129, %27 : vector<8x32xf32>
      %c0_58 = arith.constant 0 : index
      %c0_59 = arith.constant 0 : index
      %131 = vector.load %arg8[%c0_58, %c0_59] : memref<1x32xf32, #tpu.memory_space<vmem>>, vector<1x32xf32>
      %c0_60 = arith.constant 0 : index
      %c0_61 = arith.constant 0 : index
      %132 = vector.load %arg9[%c0_60, %c0_61] : memref<1x32xf32, #tpu.memory_space<vmem>>, vector<1x32xf32>
      %cst_62 = arith.constant dense<0.000000e+00> : vector<8xf32>
      %133 = vector.multi_reduction <add>, %130, %cst_62 [1] : vector<8x32xf32> to vector<8xf32>
      %134 = vector.shape_cast %133 : vector<8xf32> to vector<8x1xf32>
      %cst_63 = arith.constant 3.200000e+01 : f32
      %135 = vector.broadcast %cst_63 : f32 to vector<8x1xf32>
      %136 = arith.divf %134, %135 : vector<8x1xf32>
      %137 = vector.broadcast %136 : vector<8x1xf32> to vector<8x32xf32>
      %138 = arith.subf %130, %137 : vector<8x32xf32>
      %139 = arith.mulf %138, %138 : vector<8x32xf32>
      %cst_64 = arith.constant dense<0.000000e+00> : vector<8xf32>
      %140 = vector.multi_reduction <add>, %139, %cst_64 [1] : vector<8x32xf32> to vector<8xf32>
      %141 = vector.shape_cast %140 : vector<8xf32> to vector<8x1xf32>
      %cst_65 = arith.constant 3.200000e+01 : f32
      %142 = vector.broadcast %cst_65 : f32 to vector<8x1xf32>
      %143 = arith.divf %141, %142 : vector<8x1xf32>
      %cst_66 = arith.constant 9.99999996E-13 : f32
      %144 = vector.broadcast %cst_66 : f32 to vector<8x1xf32>
      %145 = arith.addf %143, %144 : vector<8x1xf32>
      %146 = math.rsqrt %145 : vector<8x1xf32>
      %147 = vector.broadcast %146 : vector<8x1xf32> to vector<8x32xf32>
      %148 = arith.mulf %138, %147 : vector<8x32xf32>
      %149 = vector.broadcast %131 : vector<1x32xf32> to vector<8x32xf32>
      %150 = arith.mulf %149, %148 : vector<8x32xf32>
      %151 = vector.broadcast %132 : vector<1x32xf32> to vector<8x32xf32>
      %152 = arith.addf %150, %151 : vector<8x32xf32>
      %c0_67 = arith.constant 0 : index
      %c0_68 = arith.constant 0 : index
      %153 = vector.load %arg17[%c0_67, %c0_68] : memref<8x32xf32, #tpu.memory_space<vmem>>, vector<8x32xf32>
      tpu.vector_store %arg17[%c0_67, %c0_68], %152 {strides = array<i32>} : memref<8x32xf32, #tpu.memory_space<vmem>>, vector<8x32xf32>,
      %154 = arith.truncf %152 : vector<8x32xf32> to vector<8x32xbf16>
      %c0_69 = arith.constant 0 : index
      %c0_70 = arith.constant 0 : index
      %155 = vector.load %arg18[%c0_69, %c0_70] : memref<8x32xbf16, #tpu.memory_space<vmem>>, vector<8x32xbf16>
      tpu.vector_store %arg18[%c0_69, %c0_70], %154 {strides = array<i32>} : memref<8x32xbf16, #tpu.memory_space<vmem>>, vector<8x32xbf16>,
      %cst_71 = arith.constant 0.000000e+00 : f32
      %156 = vector.broadcast %cst_71 : f32 to vector<8x32xf32>
      %c0_72 = arith.constant 0 : index
      %c0_73 = arith.constant 0 : index
      %157 = vector.load %arg20[%c0_72, %c0_73] : memref<8x32xf32, #tpu.memory_space<vmem>>, vector<8x32xf32>
      tpu.vector_store %arg20[%c0_72, %c0_73], %156 {strides = array<i32>} : memref<8x32xf32, #tpu.memory_space<vmem>>, vector<8x32xf32>,
    } else {
    }
    %c0 = arith.constant 0 : index
    %c0_1 = arith.constant 0 : index
    %3 = vector.load %arg18[%c0, %c0_1] : memref<8x32xbf16, #tpu.memory_space<vmem>>, vector<8x32xbf16>
    %c0_2 = arith.constant 0 : index
    %c0_3 = arith.constant 0 : index
    %4 = vector.load %arg10[%c0_2, %c0_3] : memref<32x512xbf16, #tpu.memory_space<vmem>>, vector<32x512xbf16>
    %cst = arith.constant dense<0.000000e+00> : vector<8x512xf32>
    %5 = tpu.matmul %3, %4, %cst {dimension_numbers = #tpu.dot_dimension_numbers<[1], [0], [0], [1], [0, 0, 1, 1], [], []>} : vector<8x32xbf16>, vector<32x512xbf16>, vector<8x512xf32> -> vector<8x512xf32>
    %c0_4 = arith.constant 0 : index
    %c0_5 = arith.constant 0 : index
    %6 = vector.load %arg11[%c0_4, %c0_5] : memref<1x512xf32, #tpu.memory_space<vmem>>, vector<1x512xf32>
    %7 = vector.broadcast %6 : vector<1x512xf32> to vector<8x512xf32>
    %8 = arith.addf %5, %7 : vector<8x512xf32>
    %cst_6 = arith.constant 5.000000e-01 : f32
    %9 = vector.broadcast %cst_6 : f32 to vector<8x512xf32>
    %10 = arith.mulf %8, %9 : vector<8x512xf32>
    %cst_7 = arith.constant 0.707106769 : f32
    %11 = vector.broadcast %cst_7 : f32 to vector<8x512xf32>
    %12 = arith.mulf %8, %11 : vector<8x512xf32>
    %13 = math.erf %12 : vector<8x512xf32>
    %cst_8 = arith.constant 1.000000e+00 : f32
    %14 = vector.broadcast %cst_8 : f32 to vector<8x512xf32>
    %15 = arith.addf %14, %13 : vector<8x512xf32>
    %16 = arith.mulf %10, %15 : vector<8x512xf32>
    %c0_9 = arith.constant 0 : index
    %c0_10 = arith.constant 0 : index
    %17 = vector.load %arg20[%c0_9, %c0_10] : memref<8x32xf32, #tpu.memory_space<vmem>>, vector<8x32xf32>
    %18 = arith.truncf %16 : vector<8x512xf32> to vector<8x512xbf16>
    %c0_11 = arith.constant 0 : index
    %c0_12 = arith.constant 0 : index
    %19 = vector.load %arg12[%c0_11, %c0_12] : memref<512x32xbf16, #tpu.memory_space<vmem>>, vector<512x32xbf16>
    %cst_13 = arith.constant dense<0.000000e+00> : vector<8x32xf32>
    %20 = tpu.matmul %18, %19, %cst_13 {dimension_numbers = #tpu.dot_dimension_numbers<[1], [0], [0], [1], [0, 0, 1, 1], [], []>} : vector<8x512xbf16>, vector<512x32xbf16>, vector<8x32xf32> -> vector<8x32xf32>
    %21 = arith.addf %17, %20 : vector<8x32xf32>
    %c0_14 = arith.constant 0 : index
    %c0_15 = arith.constant 0 : index
    %22 = vector.load %arg20[%c0_14, %c0_15] : memref<8x32xf32, #tpu.memory_space<vmem>>, vector<8x32xf32>
    tpu.vector_store %arg20[%c0_14, %c0_15], %21 {strides = array<i32>} : memref<8x32xf32, #tpu.memory_space<vmem>>, vector<8x32xf32>,
    %c1_i32 = arith.constant 1 : i32
    %23 = arith.cmpi eq, %arg1, %c1_i32 : i32
    %24 = arith.extui %23 : i1 to i32
    %c0_i32_16 = arith.constant 0 : i32
    %25 = arith.cmpi ne, %24, %c0_i32_16 : i32
    scf.if %25 {
      %c0_17 = arith.constant 0 : index
      %c0_18 = arith.constant 0 : index
      %26 = vector.load %arg20[%c0_17, %c0_18] : memref<8x32xf32, #tpu.memory_space<vmem>>, vector<8x32xf32>
      %c0_19 = arith.constant 0 : index
      %c0_20 = arith.constant 0 : index
      %27 = vector.load %arg13[%c0_19, %c0_20] : memref<1x32xf32, #tpu.memory_space<vmem>>, vector<1x32xf32>
      %28 = vector.broadcast %27 : vector<1x32xf32> to vector<8x32xf32>
      %29 = arith.addf %26, %28 : vector<8x32xf32>
      %c0_21 = arith.constant 0 : index
      %c0_22 = arith.constant 0 : index
      %30 = vector.load %arg17[%c0_21, %c0_22] : memref<8x32xf32, #tpu.memory_space<vmem>>, vector<8x32xf32>
      %31 = arith.addf %29, %30 : vector<8x32xf32>
      %c0_23 = arith.constant 0 : index
      %c0_24 = arith.constant 0 : index
      %32 = vector.load %arg14[%c0_23, %c0_24] : memref<1x32xf32, #tpu.memory_space<vmem>>, vector<1x32xf32>
      %c0_25 = arith.constant 0 : index
      %c0_26 = arith.constant 0 : index
      %33 = vector.load %arg15[%c0_25, %c0_26] : memref<1x32xf32, #tpu.memory_space<vmem>>, vector<1x32xf32>
      %cst_27 = arith.constant dense<0.000000e+00> : vector<8xf32>
      %34 = vector.multi_reduction <add>, %31, %cst_27 [1] : vector<8x32xf32> to vector<8xf32>
      %35 = vector.shape_cast %34 : vector<8xf32> to vector<8x1xf32>
      %cst_28 = arith.constant 3.200000e+01 : f32
      %36 = vector.broadcast %cst_28 : f32 to vector<8x1xf32>
      %37 = arith.divf %35, %36 : vector<8x1xf32>
      %38 = vector.broadcast %37 : vector<8x1xf32> to vector<8x32xf32>
      %39 = arith.subf %31, %38 : vector<8x32xf32>
      %40 = arith.mulf %39, %39 : vector<8x32xf32>
      %cst_29 = arith.constant dense<0.000000e+00> : vector<8xf32>
      %41 = vector.multi_reduction <add>, %40, %cst_29 [1] : vector<8x32xf32> to vector<8xf32>
      %42 = vector.shape_cast %41 : vector<8xf32> to vector<8x1xf32>
      %cst_30 = arith.constant 3.200000e+01 : f32
      %43 = vector.broadcast %cst_30 : f32 to vector<8x1xf32>
      %44 = arith.divf %42, %43 : vector<8x1xf32>
      %cst_31 = arith.constant 9.99999996E-13 : f32
      %45 = vector.broadcast %cst_31 : f32 to vector<8x1xf32>
      %46 = arith.addf %44, %45 : vector<8x1xf32>
      %47 = math.rsqrt %46 : vector<8x1xf32>
      %48 = vector.broadcast %47 : vector<8x1xf32> to vector<8x32xf32>
      %49 = arith.mulf %39, %48 : vector<8x32xf32>
      %50 = vector.broadcast %32 : vector<1x32xf32> to vector<8x32xf32>
      %51 = arith.mulf %50, %49 : vector<8x32xf32>
      %52 = vector.broadcast %33 : vector<1x32xf32> to vector<8x32xf32>
      %53 = arith.addf %51, %52 : vector<8x32xf32>
      %c0_32 = arith.constant 0 : index
      %c0_33 = arith.constant 0 : index
      %c0_34 = arith.constant 0 : index
      %54 = vector.load %arg16[%c0_32, %c0_33, %c0_34] : memref<1x8x32xf32, #tpu.memory_space<vmem>>, vector<1x8x32xf32>
      %55 = vector.shape_cast %54 : vector<1x8x32xf32> to vector<8x32xf32>
      %56 = vector.shape_cast %53 : vector<8x32xf32> to vector<1x8x32xf32>
      tpu.vector_store %arg16[%c0_32, %c0_33, %c0_34], %56 {strides = array<i32>} : memref<1x8x32xf32, #tpu.memory_space<vmem>>, vector<1x8x32xf32>,
    } else {
    }
    return
  }
  func.func @transform_0(%arg0: i32, %arg1: i32) -> (i32, i32, i32) {
    %c0_i32 = arith.constant 0 : i32
    %c0_i32_0 = arith.constant 0 : i32
    %c0_i32_1 = arith.constant 0 : i32
    return %arg0, %c0_i32, %c0_i32_0 : i32, i32, i32
  }
  func.func @transform_1(%arg0: i32, %arg1: i32) -> (i32, i32, i32, i32) {
    %c0_i32 = arith.constant 0 : i32
    %c0_i32_0 = arith.constant 0 : i32
    %c0_i32_1 = arith.constant 0 : i32
    %c0_i32_2 = arith.constant 0 : i32
    return %arg0, %c0_i32, %c0_i32_0, %c0_i32_1 : i32, i32, i32, i32
  }
  func.func @transform_2(%arg0: i32, %arg1: i32) -> (i32, i32) {
    %c0_i32 = arith.constant 0 : i32
    %c0_i32_0 = arith.constant 0 : i32
    %c0_i32_1 = arith.constant 0 : i32
    return %c0_i32, %c0_i32_0 : i32, i32
  }
  func.func @transform_3(%arg0: i32, %arg1: i32) -> (i32, i32) {
    %c0_i32 = arith.constant 0 : i32
    %c0_i32_0 = arith.constant 0 : i32
    %c0_i32_1 = arith.constant 0 : i32
    return %c0_i32, %c0_i32_0 : i32, i32
  }
  func.func @transform_4(%arg0: i32, %arg1: i32) -> (i32, i32) {
    %c0_i32 = arith.constant 0 : i32
    %c0_i32_0 = arith.constant 0 : i32
    %c0_i32_1 = arith.constant 0 : i32
    return %c0_i32, %c0_i32_0 : i32, i32
  }
  func.func @transform_5(%arg0: i32, %arg1: i32) -> (i32, i32) {
    %c0_i32 = arith.constant 0 : i32
    %c0_i32_0 = arith.constant 0 : i32
    %c0_i32_1 = arith.constant 0 : i32
    return %c0_i32, %c0_i32_0 : i32, i32
  }
  func.func @transform_6(%arg0: i32, %arg1: i32) -> (i32, i32) {
    %c0_i32 = arith.constant 0 : i32
    %c0_i32_0 = arith.constant 0 : i32
    %c0_i32_1 = arith.constant 0 : i32
    return %c0_i32, %c0_i32_0 : i32, i32
  }
  func.func @transform_7(%arg0: i32, %arg1: i32) -> (i32, i32) {
    %c0_i32 = arith.constant 0 : i32
    %c0_i32_0 = arith.constant 0 : i32
    %c0_i32_1 = arith.constant 0 : i32
    return %c0_i32, %c0_i32_0 : i32, i32
  }
  func.func @transform_8(%arg0: i32, %arg1: i32) -> (i32, i32) {
    %c0_i32 = arith.constant 0 : i32
    %c0_i32_0 = arith.constant 0 : i32
    return %c0_i32, %arg1 : i32, i32
  }
  func.func @transform_9(%arg0: i32, %arg1: i32) -> (i32, i32) {
    %c0_i32 = arith.constant 0 : i32
    %c0_i32_0 = arith.constant 0 : i32
    return %c0_i32, %arg1 : i32, i32
  }
  func.func @transform_10(%arg0: i32, %arg1: i32) -> (i32, i32) {
    %c0_i32 = arith.constant 0 : i32
    %c0_i32_0 = arith.constant 0 : i32
    return %arg1, %c0_i32 : i32, i32
  }
  func.func @transform_11(%arg0: i32, %arg1: i32) -> (i32, i32) {
    %c0_i32 = arith.constant 0 : i32
    %c0_i32_0 = arith.constant 0 : i32
    %c0_i32_1 = arith.constant 0 : i32
    return %c0_i32, %c0_i32_0 : i32, i32
  }
  func.func @transform_12(%arg0: i32, %arg1: i32) -> (i32, i32) {
    %c0_i32 = arith.constant 0 : i32
    %c0_i32_0 = arith.constant 0 : i32
    %c0_i32_1 = arith.constant 0 : i32
    return %c0_i32, %c0_i32_0 : i32, i32
  }
  func.func @transform_13(%arg0: i32, %arg1: i32) -> (i32, i32) {
    %c0_i32 = arith.constant 0 : i32
    %c0_i32_0 = arith.constant 0 : i32
    %c0_i32_1 = arith.constant 0 : i32
    return %c0_i32, %c0_i32_0 : i32, i32
  }
  func.func @transform_14(%arg0: i32, %arg1: i32) -> (i32, i32, i32) {
    %c0_i32 = arith.constant 0 : i32
    %c0_i32_0 = arith.constant 0 : i32
    %c0_i32_1 = arith.constant 0 : i32
    return %arg0, %c0_i32, %c0_i32_0 : i32, i32, i32
  }
}

</mosaic_0001>

<bundles_post_ra>
// kernel: tpu_custom_call.1
= control target key start
LH: loop header
LB: loop body
LE: loop exit
PB: predicated region body
PF: predicated region fallthrough
CT: control target
= control target key end

     0   :  { %s2905_s0 = inlined_call_operand.vmem [shape: f32[2,8,32], index: 0, kind: input, shape index: {}]   ;;  %s2906_s1 = inlined_call_operand.vmem [shape: f32[2,1,1,8], index: 1, kind: input, shape index: {}]   ;;  %s2907_s2 = inlined_call_operand.vmem [shape: bf16[32,96], index: 2, kind: input, shape index: {}]   ;;  %s2908_s3 = inlined_call_operand.vmem [shape: f32[1,96], index: 3, kind: input, shape index: {}]   ;;  %s2909_s4 = inlined_call_operand.vmem [shape: bf16[32,32], index: 4, kind: input, shape index: {}]   ;;  %s2910_s5 = inlined_call_operand.vmem [shape: f32[1,32], index: 5, kind: input, shape index: {}]   ;;  %s2911_s6 = inlined_call_operand.vmem [shape: f32[1,32], index: 6, kind: input, shape index: {}]   ;;  %s2912_s7 = inlined_call_operand.vmem [shape: f32[1,32], index: 7, kind: input, shape index: {}]   ;;  %s2913_s8 = inlined_call_operand.vmem [shape: bf16[32,1024], index: 8, kind: input, shape index: {}]   ;;  %s2914_s9 = inlined_call_operand.vmem [shape: f32[1,1024], index: 9, kind: input, shape index: {}]   ;;  %s2915_s10 = inlined_call_operand.vmem [shape: bf16[1024,32], index: 10, kind: input, shape index: {}]   ;;  %s2916_s11 = inlined_call_operand.vmem [shape: f32[1,32], index: 11, kind: input, shape index: {}]   ;;  %s2917_s12 = inlined_call_operand.vmem [shape: f32[1,32], index: 12, kind: input, shape index: {}]   ;;  %s2918_s13 = inlined_call_operand.vmem [shape: f32[1,32], index: 13, kind: input, shape index: {}]   ;;  %s2919_s14 = inlined_call_operand.hbm [shape: f32[2,8,32], index: 14, kind: output, shape index: {}]  }
   0x1   :  { %2935 = sst [smem:[#allocation23_spill]] %s2912_s7 }
   0x2   :  { %2936 = sst [smem:[#allocation24_spill]] %s2913_s8 }
   0x3   :  { %2937 = sst [smem:[#allocation25_spill]] %s2916_s11 }
   0x4   :  { %2938 = sst [smem:[#allocation26_spill]] %s2917_s12 }
   0x5   :  { %2939 = sst [smem:[#allocation27_spill]] %s2918_s13 }
   0x6   :  { %2940 = sst [smem:[#allocation28_spill]] %s2919_s14 }
   0x7   :  { %19 = vsyncpa [#allocation8], 0 }
   0x8   :  { %21 = vsyncpa [#allocation8 + $0x1], 0  ;;  %s2546_s29 = smov 0   ;;  %s2548_s30 = smov 0  }
   0x9   :  { %s2550_s15 = smov 0   ;;  %s2552_s16 = smov 0  }
   0xa   :  { %s2554_s17 = smov 0   ;;  %s2556_s18 = smov 0  }
   0xb   :  { %s2558_s19 = smov 0   ;;  %s2560_s20 = smov 0  }
   0xc   :  { %s2562_s21 = smov 0   ;;  %s2564_s22 = smov 0  }
   0xd LB: > { %2941 = sst [smem:[#allocation10_spill]] %s2415_s29  ;;  %s1942_s23 = sadd.s32 4294967295, %s2451_s22   ;;  %s2451_s22 = sphi %s2564_s22, %s27_s22   ;;  %s2447_s21 = sphi %s2562_s21, %s2977_s21   ;;  %s2443_s20 = sphi %s2560_s20, %s2976_s20   ;;  %s2439_s19 = sphi %s2558_s19, %s2975_s19   ;;  %s2435_s18 = sphi %s2556_s18, %s2974_s18   ;;  %s2431_s17 = sphi %s2554_s17, %s2973_s17   ;;  %s2427_s16 = sphi %s2552_s16, %s2972_s16   ;;  %s2423_s15 = sphi %s2550_s15, %s2971_s15   ;;  %s2419_s30 = sphi %s2548_s30, %s2970_s30   ;;  %s2415_s29 = sphi %s2546_s29, %s2969_s29  }
   0xe   : > { %2942 = sst [smem:[#allocation11_spill]] %s2419_s30  ;;  %s1943_s24 = sadd.s32 4294967294, %s2451_s22  }
   0xf   : > { %2943 = sst [smem:[#allocation12_spill]] %s2423_s15  ;;  %s36_s25 = sadd.s32 1, %s2443_s20 }
  0x10   : > { %2944 = sst [smem:[#allocation13_spill]] %s2431_s17  ;;  %s39_s26 = sadd.s32 1, %s2447_s21 }
  0x11   : > { %2945 = sst [smem:[#allocation14_spill]] %s2443_s20  ;;  %p37_p0 = scmp.ge.s32.totalorder %s36_s25, 2 }
  0x12   : > { %2946 = sst [smem:[#allocation15_spill]] %s2447_s21  ;;  %s224_s27 = sadd.s32 1, %s2431_s17 }
  0x13   : > { %2947 = sst [smem:[#allocation16_spill]] %s2451_s22  ;;  %p231_p1 = scmp.ne.s32.totalorder %s2431_s17, %s2427_s16 }
  0x14   : > { %p232_p2 = scmp.eq.s32.totalorder %s2451_s22, 0  ;;  %s2979_s25 = smov (%p37_p0, %s36_s25), 0 }
  0x15   : > { %2948 = sst [smem:[#allocation17_spill]] %s2979_s25  ;;  %s2981_s26 = smov (!%p37_p0, %s39_s26), %s2447_s21 }
  0x16   : > { %s221_s28 = ssub.s32 %s2443_s20, %s2979_s25  ;;  %p2609_p3 = por %p232_p2, %p231_p1 }
  0x17   : > { %p41_p4 = scmp.ge.s32.totalorder %s2981_s26, 2  ;;  %p222_p5 = scmp.eq.s32.totalorder %s221_s28, 0 }
  0x18   : > { %s365_s13 = sadd.s32 1, %s2423_s15  ;;  %p375_p6 = scmp.ne.s32.totalorder %s2423_s15, %s2419_s30 }
  0x19   : > { %s2983_s26 = smov (%p41_p4, %s2981_s26), 0  ;;  %p376_p7 = scmp.eq.s32.totalorder %s1942_s23, 3 }
  0x1a   : > { %2950 = sst [smem:[#allocation18_spill]] %s2983_s26  ;;  %s362_s11 = ssub.s32 %s2447_s21, %s2983_s26 }
  0x1b   : > { %s2619_s12 = scalar_select %p222_p5, %s2431_s17, %s224_s27  }
  0x1c   : > { %p363_p8 = scmp.eq.s32.totalorder %s362_s11, 0  ;;  %p381_p9 = scmp.ne.s32.totalorder %s2419_s30, %s2415_s29 }
  0x1d   : > { %2951 = sst [smem:[#allocation19_spill]] %s2619_s12  ;;  %p2625_p10 = por %p376_p7, %p375_p6 }
  0x1e   : > { %p382_p11 = scmp.eq.s32.totalorder %s1943_s24, 3  ;;  %p1945_p13 = scmp.ge.s32.totalorder %s2451_s22, 4 }
  0x1f   : > { %s2952_s7 = scalar_select %p2625_p10, 1, 0 }
  0x20   : > { %s2630_s25 = scalar_select %p363_p8, %s2423_s15, %s365_s13  }
  0x21   : > { %2953 = sst [smem:[#allocation20_spill]] %s2952_s7  ;;  %p2632_p12 = por %p382_p11, %p381_p9 }
  0x22   : > { %2954 = sst [smem:[#allocation21_spill]] %s2630_s25  ;;  %425 = sbr.rel (%p1945_p13) target bundleno = 53 (0x35), region = 52 }
  0x23   : > { %s2955_s28 = scalar_select %p2632_p12, 1, 0 }
  0x25   : > { %2956 = sst [smem:[#allocation22_spill]] %s2955_s28 }
  0x27   : > { %441 = sbr.rel (!%p2609_p3) target bundleno = 53 (0x35), region = 64  ;;  %s443_s11 = sand.u32 (%p2609_p3), 1, %s2431_s17  }
  0x28   : > { %s2029_s23 = sshll.u32 (%p2609_p3), %s2443_s20, 4  ;;  %s1946_s27 = sshll.u32 (%p2609_p3), %s443_s11, 6 }
  0x29   : > { %s2957_s8 = sld [smem:[#allocation24_spill]] (%p2609_p3)  ;;  %s445_s24 = scalar_lea.vmem (%p2609_p3), [#allocation6], %s1946_s27 }
  0x2f   : > { %s448_s13 = scalar_lea.vmem %s2957_s8, %s2029_s23 }
  0x30   : > { %v461_v0 = vld [vmem:[%s448_s13] sm:$0xff]  ;;  %v463_v1 = vld [vmem:[%s448_s13 + $0x8] sm:$0xff] }
  0x31   : > { %v465_v2 = vld [vmem:[%s448_s13 + $0x20] sm:$0xff]  ;;  %462 = vst [vmem:[%s445_s24] sm:$0xff] %v461_v0  ;;  %464 = vst [vmem:[%s445_s24 + $0x8] sm:$0xff] %v463_v1  ;;  %v467_v3 = vld [vmem:[%s448_s13 + $0x28] sm:$0xff] }
  0x32   : > { %466 = vst [vmem:[%s445_s24 + $0x10] sm:$0xff] %v465_v2  ;;  %v469_v4 = vld [vmem:[%s448_s13 + $0x40] sm:$0xff]  ;;  %v471_v5 = vld [vmem:[%s448_s13 + $0x48] sm:$0xff]  ;;  %468 = vst [vmem:[%s445_s24 + $0x18] sm:$0xff] %v467_v3 }
  0x33   : > { %470 = vst [vmem:[%s445_s24 + $0x20] sm:$0xff] %v469_v4  ;;  %472 = vst [vmem:[%s445_s24 + $0x28] sm:$0xff] %v471_v5  ;;  %v473_v6 = vld [vmem:[%s448_s13 + $0x60] sm:$0xff]  ;;  %v475_v7 = vld [vmem:[%s448_s13 + $0x68] sm:$0xff] }
  0x34   : > { %474 = vst [vmem:[%s445_s24 + $0x30] sm:$0xff] %v473_v6  ;;  %476 = vst [vmem:[%s445_s24 + $0x38] sm:$0xff] %v475_v7 }
  0x35 PF: > { %p1949_p0 = scmp.ge.s32.totalorder %s2451_s22, 1  ;;  %p498_p1 = scmp.lt.s32.totalorder %s2451_s22, 5 }
  0x37   : > { %p499_p2 = pnand %p1949_p0, %p498_p1 }
  0x38   : > { %s505_s14 = sand.u32 (!%p499_p2), 1, %s2427_s16   ;;  %s2925_s21 = sand.u32 (!%p499_p2), 1, %s2419_s30  }
  0x39   : > { %502 = sbr.rel (%p499_p2) target bundleno = 2575 (0xa0f), region = 95  ;;  %s1950_s26 = sshll.u32 (!%p499_p2), %s505_s14, 6 }
  0x3a   : > { %s2650_s11 = sshll.u32 (!%p499_p2), %s2925_s21, 3  ;;  %p566_p3 = scmp.lt.s32.totalorder (!%p499_p2), %s2439_s19, 1 }
  0x3b   : > { %s1953_s23 = sshll.u32 (!%p499_p2), %s2435_s18, 2  ;;  %s1954_s27 = sshll.u32 (!%p499_p2), %s2435_s18, 6 }
  0x3c   : > { %p575_p4 = scmp.lt.s32.totalorder (!%p499_p2), %s1953_s23, 7  ;;  %p580_p5 = scmp.lt.s32.totalorder (!%p499_p2), %s1954_s27, 127 }
  0x3d   : > { %s2677_s30 = scalar_lea.vmem (!%p499_p2), [#allocation6], %s1950_s26  ;;  %s565_s8 = scalar_lea.vmem (!%p499_p2), [#allocation7], %s2650_s11 }
  0x3e   : > { %s2656_s13 = scalar_select %p566_p3, %s2439_s19, 1 }
  0x3f   : > { %s2985_s23 = smov (!%p575_p4, %s1953_s23), 7  ;;  %s2987_s27 = smov (!%p580_p5, %s1954_s27), 127 }
  0x40   : > { %s1952_s24 = sshll.u32 %s2656_s13, 3  ;;  %s572_s14 = scalar_lea.vmem %s2906_s1, %s2656_s13 }
  0x41   : > { %s569_s12 = scalar_lea.vmem %s2905_s0, %s1952_s24  ;;  %s577_s15 = scalar_lea.vmem %s2914_s9, %s2985_s23 }
  0x42   : > { %s1955_s28 = sshll.u32 %s2987_s27, 2  ;;  %p1956_p6 = scmp.ne.s32.totalorder %s2435_s18, 0 }
  0x43   : > { %s2675_s7 = scalar_lea.vmem %s2915_s10, %s1955_s28  ;;  %s2455_s25 = smov (!%p1956_p6), 96  }
  0x44   : > { %589 = sbr.rel (%p1956_p6) target bundleno = 1798 (0x706), region = 103  ;;  %s2456_s28 = smov (!%p1956_p6), 120  }
  0x45   : > { %s2457_s26 = smov (!%p1956_p6), 88   ;;  %s2458_s27 = smov (!%p1956_p6), 80  }
  0x46   : > { %s2459_s24 = smov (!%p1956_p6), 112   ;;  %s2460_s16 = smov (!%p1956_p6), 72  }
  0x47   : > { %s2461_s20 = smov (!%p1956_p6), 104   ;;  %s2462_s13 = smov (!%p1956_p6), 56  }
  0x48   : > { %s2464_s29 = smov (!%p1956_p6), 40   ;;  %s2466_s22 = smov (!%p1956_p6), 8  }
  0x49   : > { %v2267_v8 = vld [vmem:[%s2907_s2 + $0x8] sm:$0xff]   ;;  %v2453_v9 = vmov 0.0   ;;  %v2268_v10 = vld [vmem:[%s2907_s2] sm:$0xff]   ;;  %vm2454_vm0 = vmmov 0   ;;  %vm616_vm1 = vcmask 261120   ;;  %vm672_vm2 = vcmask 64512  }
  0x4a   : > { %2099 = vmatprep.subr.bf16.mxu0 %v2453_v9  ;;  %2107 = vmatprep.subr.bf16.mxu1 %v2453_v9  ;;  %v2691_v11 = vld [vmem:[%s569_s12] sm:$0xff]  ;;  %1243 = vst.msk [vmem:[#allocation5] sm:$0xff] %vm616_vm1, %v2453_v9  ;;  %s2465_s12 = smov 48   ;;  %vm736_vm3 = vcmask 1043456   ;;  %vm781_vm4 = vcmask 60416   ;;  %vm901_vm5 = vcmask 126016  }
  0x4b   : > { %2100 = vmatpush3.bf16.msra.mxu0 %v2267_v8  ;;  %2103 = vmatprep.mubr.msk.bf16.mxu0 %vm2454_vm0, %v2453_v9  ;;  %v591_v12 = vpack.c.bf16 %v2691_v11, %v2691_v11  ;;  %v1957_v13 = vld [vmem:[%s2908_s3] ss:$0 sm:$0xff]  ;;  %vm1020_vm6 = vcmask 191616   ;;  %vm1139_vm7 = vcmask 257216   ;;  %vm1241_vm8 = vcmask 257024  }
  0x4c   : > { %2101 = vmatprep.subr.bf16.mxu0 %v2453_v9  ;;  %2109 = vmatprep.mubr.msk.bf16.mxu1 %vm2454_vm0, %v2453_v9  ;;  %v1961_v33 = vld [vmem:[%s572_s14] ss:$0 sm:$0xff]  ;;  %s2463_s14 = smov 64  }
  0x4f   : > { %2102 = vmatpush3.bf16.msra.mxu0 %v2268_v10 }
  0x50   : > { %2113 = vmatprep.subr.bf16.mxu0 %v2453_v9 }
  0x52   : > { %2104 = vmatmul.mubr.msk.bf16.vlgmr.msra.gmra.mxu0 %vm616_vm1, %v591_v12 }
  0x53   : > { %2115 = vmatprep.mubr.msk.bf16.mxu0 %vm2454_vm0, %v2453_v9 }
 0x112   : > { %v654_v14 = vpop.f32.mrf.mxu0 }
 0x113   : > { %v655_v15 = vadd.f32 %v1957_v13, %v654_v14 }
 0x114   : > { %v2105_v16 = vpop.f32.mrf.mxu0 }
 0x115   : > { %v660_v17 = vmul.f32 0.35355338, %v655_v15  ;;  %v2707_v18 = vpack.c.bf16 %v655_v15, %v655_v15 }
 0x116   : > { %v657_v19 = vpop.f32.mrf.mxu0 }
 0x117   : > { %v661_v20 = vpack.c.bf16 %v660_v17, %v660_v17  ;;  %670 = vrot.lane.b32.xlu0 %v2707_v18, %s2455_s25 }
 0x118   : > { %v2106_v21 = vpop.f32.mrf.mxu0 }
 0x119   : > { %784 = vrot.lane.b32.xlu1 %v661_v20, %s2456_s28 }
 0x11b   : > { %786 = vrot.lane.b32.xlu0 %v2707_v18, %s2457_s26 }
 0x11d   : > { %905 = vrot.lane.b32.xlu1 %v2707_v18, %s2458_s27 }
 0x11f   : > { %903 = vrot.lane.b32.xlu0 %v661_v20, %s2459_s24  ;;  %s2467_s24 = smov 16  }
 0x121   : > { %1024 = vrot.lane.b32.xlu1 %v2707_v18, %s2460_s16  ;;  %s2468_s16 = smov 24  }
 0x123   : > { %1022 = vrot.lane.b32.xlu0 %v661_v20, %s2461_s20 }
 0x189   : > { %v671_v22 = vpop.permute.xlu0 %670 }
 0x18a   : > { %v677_v23 = vsel %vm672_vm2, %v671_v22, 0 }
 0x18b   : > { %2108 = vmatpush3.bf16.xpose.msra.mxu1 %v677_v23  ;;  %v785_v25 = vpop.permute.xlu1 %784 }
 0x18c   : > { %2119 = vmatprep.subr.bf16.mxu1 %v2453_v9 }
 0x18d   : > { %v787_v24 = vpop.permute.xlu0 %786 }
 0x18e   : > { %v792_v26 = vsel %vm672_vm2, %v787_v24, 0 }
 0x18f   : > { %v906_v27 = vpop.permute.xlu1 %905 }
 0x190   : > { %v911_v28 = vsel %vm672_vm2, %v906_v27, 0 }
 0x191   : > { %v904_v30 = vpop.permute.xlu0 %903 }
 0x192   : > { %2110 = vmatmul.mubr.msk.bf16.vlgmr.msra.gmra.mxu1 %vm672_vm2, %v661_v20 }
 0x193   : > { %2120 = vmatpush3.bf16.xpose.msra.mxu1 %v792_v26  ;;  %2121 = vmatprep.mubr.msk.bf16.mxu1 %vm2454_vm0, %v2453_v9  ;;  %v1025_v29 = vpop.permute.xlu1 %1024 }
 0x194   : > { %2131 = vmatprep.subr.bf16.mxu1 %v2453_v9  ;;  %v1030_v31 = vsel %vm672_vm2, %v1025_v29, 0 }
 0x195   : > { %v1023_v32 = vpop.permute.xlu0 %1022 }
 0x19a   : > { %2122 = vmatmul.mubr.msk.bf16.vlgmr.msra.gmra.mxu1 %vm672_vm2, %v785_v25 }
 0x19b   : > { %2132 = vmatpush3.bf16.xpose.msra.mxu1 %v911_v28  ;;  %2133 = vmatprep.mubr.msk.bf16.mxu1 %vm2454_vm0, %v2453_v9 }
 0x19c   : > { %2143 = vmatprep.subr.bf16.mxu1 %v2453_v9 }
 0x1a2   : > { %2134 = vmatmul.mubr.msk.bf16.vlgmr.msra.gmra.mxu1 %vm672_vm2, %v904_v30 }
 0x1a3   : > { %2144 = vmatpush3.bf16.xpose.msra.mxu1 %v1030_v31  ;;  %2145 = vmatprep.mubr.msk.bf16.mxu1 %vm2454_vm0, %v2453_v9 }
 0x1a4   : > { %2155 = vmatprep.subr.bf16.mxu1 %v2453_v9 }
 0x1aa   : > { %2146 = vmatmul.mubr.msk.bf16.vlgmr.msra.gmra.mxu1 %vm672_vm2, %v1023_v32 }
 0x1ab   : > { %2159 = vmatprep.mubr.msk.bf16.mxu1 %vm2454_vm0, %v2453_v9 }
 0x252   : > { %v713_v34 = vpop.f32.mrf.mxu1 }
 0x253   : > { %v714_v35 = vadd.f32 %v1961_v33, %v713_v34 }
 0x254   : > { %v2111_v36 = vpop.f32.mrf.mxu1 }
 0x255   : > { %v719_v37 = vsel %vm672_vm2, %v714_v35, -inf }
 0x256   : > { %720 = vmax.xlane.f32.xlu1 %v719_v37  ;;  %v716_v38 = vpop.f32.mrf.mxu1 }
 0x258   : > { %v2112_v39 = vpop.f32.mrf.mxu1 }
 0x25a   : > { %v828_v40 = vpop.f32.mrf.mxu1 }
 0x25b   : > { %v829_v41 = vadd.f32 %v1961_v33, %v828_v40 }
 0x25c   : > { %v2123_v42 = vpop.f32.mrf.mxu1 }
 0x25d   : > { %v834_v43 = vsel %vm672_vm2, %v829_v41, -inf }
 0x25e   : > { %835 = vmax.xlane.f32.xlu0 %v834_v43  ;;  %v831_v44 = vpop.f32.mrf.mxu1 }
 0x260   : > { %v2124_v45 = vpop.f32.mrf.mxu1 }
 0x262   : > { %v947_v46 = vpop.f32.mrf.mxu1 }
 0x263   : > { %v948_v47 = vadd.f32 %v1961_v33, %v947_v46 }
 0x264   : > { %v2135_v48 = vpop.f32.mrf.mxu1 }
 0x265   : > { %v953_v49 = vsel %vm672_vm2, %v948_v47, -inf }
 0x266   : > { %954 = vmax.xlane.f32.xlu0 %v953_v49  ;;  %v950_v50 = vpop.f32.mrf.mxu1 }
 0x267   : > { %v2269_v50 = vld [vmem:[%s2909_s4 + $0x8] sm:$0xff]  }
 0x268   : > { %v2136_v51 = vpop.f32.mrf.mxu1  ;;  %2156 = vmatpush3.bf16.msra.mxu1 %v2269_v50 }
 0x269   : > { %2157 = vmatprep.subr.bf16.mxu1 %v2453_v9 }
 0x26a   : > { %v1066_v52 = vpop.f32.mrf.mxu1 }
 0x26b   : > { %v1067_v53 = vadd.f32 %v1961_v33, %v1066_v52 }
 0x26c   : > { %v2147_v54 = vpop.f32.mrf.mxu1 }
 0x26d   : > { %v1072_v55 = vsel %vm672_vm2, %v1067_v53, -inf }
 0x26e   : > { %1073 = vmax.xlane.f32.xlu1 %v1072_v55  ;;  %v1069_v56 = vpop.f32.mrf.mxu1 }
 0x270   : > { %v2148_v57 = vpop.f32.mrf.mxu1 }
 0x2df   : > { %v721_v58 = vpop.xlane.xlu1 %720 }
 0x2e0   : > { %v722_v59 = vsub.f32 %v714_v35, %v721_v58 }
 0x2e2   : > { %v723_v60 = vmul.f32 1.442695, %v722_v59 }
 0x2e4   : > { %2271 = vpow2.f32 %v723_v60 }
 0x2e7   : > { %v836_v61 = vpop.xlane.xlu0 %835 }
 0x2e8   : > { %v837_v62 = vsub.f32 %v829_v41, %v836_v61 }
 0x2ea   : > { %v838_v63 = vmul.f32 1.442695, %v837_v62 }
 0x2ec   : > { %2273 = vpow2.f32 %v838_v63 }
 0x2ef   : > { %v955_v0 = vpop.xlane.xlu0 %954 }
 0x2f0   : > { %v956_v1 = vsub.f32 %v948_v47, %v955_v0 }
 0x2f1   : > { %v2272_v2 = vpop.eup %2271 }
 0x2f2   : > { %v957_v3 = vmul.f32 1.442695, %v956_v1  ;;  %v725_v4 = vsel %vm672_vm2, %v2272_v2, 0.0  ;;  %v1973_v1 = vld [vmem:[%s2910_s5] ss:$0 sm:$0xff] }
 0x2f3   : > { %726 = vadd.xlane.f32.xlu0 %v725_v4 }
 0x2f4   : > { %2275 = vpow2.f32 %v957_v3 }
 0x2f7   : > { %v1074_v10 = vpop.xlane.xlu1 %1073 }
 0x2f8   : > { %v1075_v12 = vsub.f32 %v1067_v53, %v1074_v10  ;;  %v2270_v53 = vld [vmem:[%s2909_s4] sm:$0xff]  }
 0x2f9   : > { %v2274_v5 = vpop.eup %2273  ;;  %2158 = vmatpush3.bf16.msra.mxu1 %v2270_v53 }
 0x2fa   : > { %v840_v6 = vsel %vm672_vm2, %v2274_v5, 0.0  ;;  %v1076_v13 = vmul.f32 1.442695, %v1075_v12 }
 0x2fb   : > { %841 = vadd.xlane.f32.xlu1 %v840_v6 }
 0x2fc   : > { %2277 = vpow2.f32 %v1076_v13 }
 0x301   : > { %v2276_v7 = vpop.eup %2275 }
 0x302   : > { %v959_v8 = vsel %vm672_vm2, %v2276_v7, 0.0 }
 0x303   : > { %960 = vadd.xlane.f32.xlu0 %v959_v8 }
 0x309   : > { %v2278_v14 = vpop.eup %2277 }
 0x30a   : > { %v1078_v15 = vsel %vm672_vm2, %v2278_v14, 0.0 }
 0x30c   : > { %846 = vrot.lane.b32.xlu1 %v2707_v18, %s2462_s13 }
 0x319   : > { %731 = vrot.lane.b32.xlu0 %v2707_v18, %s2463_s14 }
 0x31d   : > { %1084 = vrot.lane.b32.xlu0 %v2707_v18, %s2464_s29 }
 0x330   : > { %1079 = vadd.xlane.f32.xlu1 %v1078_v15 }
 0x341   : > { %965 = vrot.lane.b32.xlu1 %v2707_v18, %s2465_s12  ;;  %s2958_s12 = sld [smem:[#allocation23_spill]] }
 0x37c   : > { %v727_v16 = vpop.xlane.xlu0 %726 }
 0x37d   : > { %2279 = vrcp.f32 %v727_v16 }
 0x384   : > { %v842_v17 = vpop.xlane.xlu1 %841 }
 0x385   : > { %2281 = vrcp.f32 %v842_v17 }
 0x388   : > { %v847_v24 = vpop.permute.xlu1 %846 }
 0x389   : > { %v852_v27 = vsel %vm736_vm3, %v847_v24, 0 }
 0x38a   : > { %v2280_v19 = vpop.eup %2279 }
 0x38b   : > { %v729_v21 = vmul.f32 %v2280_v19, %v2272_v2 }
 0x38c   : > { %v961_v20 = vpop.xlane.xlu0 %960 }
 0x38d   : > { %v730_v25 = vpack.c.bf16 %v729_v21, %v729_v21  ;;  %2283 = vrcp.f32 %v961_v20 }
 0x390   : > { %v732_v22 = vpop.permute.xlu0 %731 }
 0x391   : > { %v738_v23 = vsel %vm736_vm3, %v732_v22, 0  ;;  %v1978_v22 = vld [vmem:[%s2958_s12] ss:$0 sm:$0xff] }
 0x392   : > { %2114 = vmatpush3.bf16.msra.mxu0 %v738_v23  ;;  %v2282_v26 = vpop.eup %2281 }
 0x393   : > { %2125 = vmatprep.subr.bf16.mxu0 %v2453_v9  ;;  %v844_v18 = vmul.f32 %v2282_v26, %v2274_v5 }
 0x394   : > { %v1085_v34 = vpop.permute.xlu0 %1084 }
 0x395   : > { %2116 = vmatmul.mubr.msk.bf16.vlgmr.msra.gmra.mxu0 %vm672_vm2, %v730_v25  ;;  %v845_v28 = vpack.c.bf16 %v844_v18, %v844_v18  ;;  %v1090_v36 = vsel %vm736_vm3, %v1085_v34, 0 }
 0x396   : > { %2126 = vmatpush3.bf16.msra.mxu0 %v852_v27  ;;  %2127 = vmatprep.mubr.msk.bf16.mxu0 %vm2454_vm0, %v2453_v9 }
 0x397   : > { %2137 = vmatprep.subr.bf16.mxu0 %v2453_v9 }
 0x39a   : > { %v2284_v29 = vpop.eup %2283 }
 0x39b   : > { %v963_v31 = vmul.f32 %v2284_v29, %v2276_v7 }
 0x39d   : > { %2128 = vmatmul.mubr.msk.bf16.vlgmr.msra.gmra.mxu0 %vm672_vm2, %v845_v28  ;;  %v964_v35 = vpack.c.bf16 %v963_v31, %v963_v31 }
 0x39e   : > { %2139 = vmatprep.mubr.msk.bf16.mxu0 %vm2454_vm0, %v2453_v9 }
 0x3b9   : > { %v1080_v30 = vpop.xlane.xlu1 %1079 }
 0x3ba   : > { %2285 = vrcp.f32 %v1080_v30 }
 0x3bd   : > { %v966_v32 = vpop.permute.xlu1 %965 }
 0x3be   : > { %v971_v33 = vsel %vm736_vm3, %v966_v32, 0 }
 0x3bf   : > { %2138 = vmatpush3.bf16.msra.mxu0 %v971_v33 }
 0x3c0   : > { %2149 = vmatprep.subr.bf16.mxu0 %v2453_v9 }
 0x3c2   : > { %2140 = vmatmul.mubr.msk.bf16.vlgmr.msra.gmra.mxu0 %vm672_vm2, %v964_v35 }
 0x3c3   : > { %2150 = vmatpush3.bf16.msra.mxu0 %v1090_v36  ;;  %2151 = vmatprep.mubr.msk.bf16.mxu0 %vm2454_vm0, %v2453_v9 }
 0x3c7   : > { %v2286_v37 = vpop.eup %2285 }
 0x3c8   : > { %v1082_v38 = vmul.f32 %v2286_v37, %v2278_v14 }
 0x3ca   : > { %v1083_v39 = vpack.c.bf16 %v1082_v38, %v1082_v38 }
 0x3cc   : > { %2152 = vmatmul.mubr.msk.bf16.vlgmr.msra.gmra.mxu0 %vm672_vm2, %v1083_v39 }
 0x455   : > { %v774_v40 = vpop.f32.mrf.mxu0 }
 0x456   : > { %v780_v41 = vpack.c.bf16 %v774_v40, %v774_v40 }
 0x457   : > { %v2117_v42 = vpop.f32.mrf.mxu0 }
 0x458   : > { %782 = vst.msk [vmem:[#allocation4] sm:$0xf] %vm781_vm4, %v780_v41 }
 0x459   : > { %v777_v43 = vpop.f32.mrf.mxu0 }
 0x45b   : > { %v2118_v44 = vpop.f32.mrf.mxu0 }
 0x45d   : > { %v888_v45 = vpop.f32.mrf.mxu0 }
 0x45e   : > { %v2030_v46 = vpack.c.bf16 %v888_v45, %v888_v45 }
 0x45f   : > { %v2129_v47 = vpop.f32.mrf.mxu0 }
 0x460   : > { %898 = vrot.lane.b32.xlu1 %v2030_v46, %s2466_s22 }
 0x461   : > { %v891_v48 = vpop.f32.mrf.mxu0 }
 0x463   : > { %v2130_v49 = vpop.f32.mrf.mxu0 }
 0x482   : > { %v1007_v51 = vpop.f32.mrf.mxu0 }
 0x483   : > { %v2031_v52 = vpack.c.bf16 %v1007_v51, %v1007_v51 }
 0x484   : > { %v2141_v54 = vpop.f32.mrf.mxu0 }
 0x485   : > { %1017 = vrot.lane.b32.xlu0 %v2031_v52, %s2467_s24 }
 0x486   : > { %v1010_v55 = vpop.f32.mrf.mxu0 }
 0x488   : > { %v2142_v56 = vpop.f32.mrf.mxu0 }
 0x48c   : > { %v1126_v57 = vpop.f32.mrf.mxu0 }
 0x48d   : > { %v2032_v58 = vpack.c.bf16 %v1126_v57, %v1126_v57 }
 0x48e   : > { %v2153_v59 = vpop.f32.mrf.mxu0 }
 0x48f   : > { %1136 = vrot.lane.b32.xlu1 %v2032_v58, %s2468_s16 }
 0x490   : > { %v1129_v60 = vpop.f32.mrf.mxu0 }
 0x492   : > { %v2154_v61 = vpop.f32.mrf.mxu0 }
 0x4d2   : > { %v899_v62 = vpop.permute.xlu1 %898 }
 0x4d3   : > { %902 = vst.msk [vmem:[#allocation4] sm:$0xf] %vm901_vm5, %v899_v62 }
 0x4f7   : > { %v1018_v63 = vpop.permute.xlu0 %1017 }
 0x4f8   : > { %1021 = vst.msk [vmem:[#allocation4] sm:$0xf] %vm1020_vm6, %v1018_v63 }
 0x501   : > { %v1137_v9 = vpop.permute.xlu1 %1136 }
 0x502   : > { %1140 = vst.msk [vmem:[#allocation4] sm:$0xf] %vm1139_vm7, %v1137_v9 }
 0x509   : > { %v1141_v0 = vld [vmem:[#allocation4] sm:$0xf] }
 0x50a   : > { %2160 = vmatmul.mubr.msk.bf16.vlgmr.msra.gmra.mxu1 %vm616_vm1, %v1141_v0 }
 0x5ca   : > { %v1202_v2 = vpop.f32.mrf.mxu1 }
 0x5cb   : > { %v1203_v3 = vadd.f32 %v1973_v1, %v1202_v2 }
 0x5cc   : > { %v2161_v4 = vpop.f32.mrf.mxu1 }
 0x5cd   : > { %v1208_v5 = vadd.f32 %v1203_v3, %v2691_v11  ;;  %v1977_v11 = vld [vmem:[%s2911_s6] ss:$0 sm:$0xff] }
 0x5ce   : > { %v1205_v6 = vpop.f32.mrf.mxu1 }
 0x5cf   : > { %v1211_v7 = vsel %vm616_vm1, %v1208_v5, 0.0 }
 0x5d0   : > { %1212 = vadd.xlane.f32.xlu0 %v1211_v7  ;;  %v2162_v8 = vpop.f32.mrf.mxu1 }
 0x659   : > { %v1213_v10 = vpop.xlane.xlu0 %1212 }
 0x65a   : > { %v1215_v12 = vmul.f32 0.03125, %v1213_v10 }
 0x65c   : > { %v1216_v13 = vsub.f32 %v1208_v5, %v1215_v12 }
 0x65e   : > { %v1217_v14 = vmul.f32 %v1216_v13, %v1216_v13 }
 0x660   : > { %v1218_v15 = vsel %vm616_vm1, %v1217_v14, 0.0 }
 0x661   : > { %1219 = vadd.xlane.f32.xlu1 %v1218_v15 }
 0x6ea   : > { %v1220_v16 = vpop.xlane.xlu1 %1219 }
 0x6eb   : > { %v1221_v17 = vmul.f32 0.03125, %v1220_v16 }
 0x6ed   : > { %v1222_v19 = vadd.f32 1e-12, %v1221_v17 }
 0x6ef   : > { %2287 = vrsqrt.f32 %v1222_v19 }
 0x6fc   : > { %v2288_v20 = vpop.eup %2287 }
 0x6fd   : > { %v1224_v21 = vmul.f32 %v2288_v20, %v1216_v13 }
 0x6ff   : > { %v1231_v23 = vmul.f32 %v1977_v11, %v1224_v21 }
 0x701   : > { %v1238_v24 = vadd.f32 %v1978_v22, %v1231_v23 }
 0x703   : > { %1239 = vst.msk [vmem:[#allocation2] sm:$0xff] %vm616_vm1, %v1238_v24  ;;  %v1240_v25 = vpack.c.bf16 %v1238_v24, %v1238_v24 }
 0x705   : > { %1242 = vst.msk [vmem:[#allocation3] sm:$0xf] %vm1241_vm8, %v1240_v25 }
 0x706 PF: > { %v2289_v26 = vld [vmem:[%s2677_s30 + $0x24] ss:$16 sps:$4 sm:$0xff]   ;;  %v2291_v27 = vld [vmem:[%s2677_s30 + $0x2c] ss:$16 sps:$4 sm:$0xff]   ;;  %v2469_v18 = vmov 0   ;;  %vm1315_vm9 = vcmask 261120   ;;  %v1255_v2 = vlaneseq }
 0x707   : > { %1351 = vmatprep.mubr.bf16.mxu0 %v2469_v18  ;;  %1392 = vmatprep.mubr.bf16.mxu1 %v2469_v18  ;;  %v2293_v28 = vld [vmem:[%s2677_s30 + $0x20] ss:$16 sps:$4 sm:$0xff]   ;;  %v2294_v29 = vld [vmem:[%s2677_s30 + $0x28] ss:$16 sps:$4 sm:$0xff]   ;;  %v2295_v30 = vld [vmem:[%s2677_s30 + $0x4] ss:$16 sps:$4 sm:$0xff]  }
 0x708   : > { %1331 = vmatprep.subr.bf16.mxu0 %v2289_v26  ;;  %1372 = vmatprep.subr.bf16.mxu1 %v2291_v27  ;;  %v2297_v31 = vld [vmem:[%s2677_s30 + $0xc] ss:$16 sps:$4 sm:$0xff]   ;;  %v2299_v32 = vld [vmem:[%s2677_s30] ss:$16 sps:$4 sm:$0xff]   ;;  %v2300_v33 = vld [vmem:[%s2677_s30 + $0x8] ss:$16 sps:$4 sm:$0xff]  }
 0x709   : > { %1332 = vmatpush1.bf16.msra.mxu0 %v2293_v28  ;;  %1373 = vmatpush1.bf16.msra.mxu1 %v2294_v29  ;;  %v2301_v35 = vld [vmem:[%s2675_s7 + $0x78] sm:$0xff]   ;;  %v2305_v39 = vld [vmem:[%s2675_s7 + $0x70] sm:$0xff]   ;;  %v2309_v43 = vld [vmem:[%s2675_s7 + $0x68] sm:$0xff]   ;;  %v1256_v3 = vshrl.u32 %v1255_v2, 7  ;;  %p2021_p7 = scmp.ne.s32.totalorder %s2435_s18, 1 }
 0x70a   : > { %1333 = vmatprep.subr.bf16.mxu0 %v2295_v30  ;;  %1374 = vmatprep.subr.bf16.mxu1 %v2297_v31  ;;  %v2302_v36 = vld [vmem:[%s2675_s7 + $0xf8] sm:$0xff]   ;;  %v2306_v40 = vld [vmem:[%s2675_s7 + $0xf0] sm:$0xff]   ;;  %v2310_v44 = vld [vmem:[%s2675_s7 + $0xe8] sm:$0xff]   ;;  %s2959_s23 = sld [smem:[#allocation25_spill]] (!%p2021_p7) }
 0x70b   : > { %v2303_v37 = vld [vmem:[%s2675_s7 + $0x38] sm:$0xff]   ;;  %v2307_v41 = vld [vmem:[%s2675_s7 + $0x30] sm:$0xff]   ;;  %v2311_v45 = vld [vmem:[%s2675_s7 + $0x28] sm:$0xff]   ;;  %v1257_v4 = vsub.s32 0, %v1256_v3  ;;  %v1265_v5 = vsub.s32 2, %v1256_v3  ;;  %v1261_v7 = vsub.s32 1, %v1256_v3 }
 0x70c   : > { %v1244_v34 = vld [vmem:[#allocation3] sm:$0xf]  ;;  %v2304_v38 = vld [vmem:[%s2675_s7 + $0xb8] sm:$0xff]   ;;  %v2308_v42 = vld [vmem:[%s2675_s7 + $0xb0] sm:$0xff]   ;;  %v1269_v8 = vsub.s32 3, %v1256_v3  ;;  %s2960_s28 = sld [smem:[#allocation26_spill]] (!%p2021_p7) }
 0x70d   : > { %1334 = vmatpush1.bf16.msra.mxu0 %v2299_v32  ;;  %1375 = vmatpush1.bf16.msra.mxu1 %v2300_v33  ;;  %v2312_v46 = vld [vmem:[%s2675_s7 + $0xa8] sm:$0xff]   ;;  %v2313_v47 = vld [vmem:[%s2675_s7 + $0x60] sm:$0xff]   ;;  %v2317_v51 = vld [vmem:[%s2675_s7 + $0x58] sm:$0xff]   ;;  %s2961_s24 = sld [smem:[#allocation27_spill]] (!%p2021_p7) }
 0x70e   : > { %2055 = vmatprep.subr.bf16.mxu0 %v2301_v35  ;;  %2077 = vmatprep.subr.bf16.mxu1 %v2302_v36  ;;  %v2314_v48 = vld [vmem:[%s2675_s7 + $0xe0] sm:$0xff]   ;;  %v2318_v52 = vld [vmem:[%s2675_s7 + $0xd8] sm:$0xff]   ;;  %v2321_v55 = vld [vmem:[%s2675_s7 + $0x50] sm:$0xff]  }
 0x70f   : > { %v2315_v49 = vld [vmem:[%s2675_s7 + $0x20] sm:$0xff]   ;;  %v2319_v53 = vld [vmem:[%s2675_s7 + $0x18] sm:$0xff]   ;;  %v2322_v56 = vld [vmem:[%s2675_s7 + $0xd0] sm:$0xff]  }
 0x710   : > { %1987 = vmatmul.mubr.msk.bf16.vlgmr.msra.gmra.mxu0 %vm1315_vm9, %v1244_v34  ;;  %1988 = vmatmul.mubr.msk.bf16.vlgmr.msra.gmra.mxu1 %vm1315_vm9, %v1244_v34  ;;  %v2316_v50 = vld [vmem:[%s2675_s7 + $0xa0] sm:$0xff]   ;;  %v2320_v54 = vld [vmem:[%s2675_s7 + $0x98] sm:$0xff]   ;;  %v2323_v57 = vld [vmem:[%s2675_s7 + $0x10] sm:$0xff]  }
 0x711   : > { %2056 = vmatpush3.bf16.msra.mxu0 %v2303_v37  ;;  %2078 = vmatpush3.bf16.msra.mxu1 %v2304_v38  ;;  %v2324_v58 = vld [vmem:[%s2675_s7 + $0x90] sm:$0xff]   ;;  %v2325_v59 = vld [vmem:[%s2675_s7 + $0x48] sm:$0xff]   ;;  %v2329_v63 = vld [vmem:[%s2675_s7 + $0x40] sm:$0xff]  }
 0x712   : > { %2057 = vmatprep.subr.bf16.mxu0 %v2305_v39  ;;  %2079 = vmatprep.subr.bf16.mxu1 %v2306_v40  ;;  %v2326_v60 = vld [vmem:[%s2675_s7 + $0xc8] sm:$0xff]   ;;  %v2330_v9 = vld [vmem:[%s2675_s7 + $0xc0] sm:$0xff]  }
 0x713   : > { %v2327_v61 = vld [vmem:[%s2675_s7 + $0x8] sm:$0xff]   ;;  %v2331_v0 = vld [vmem:[%s2675_s7] sm:$0xff]  }
 0x714   : > { %v2328_v62 = vld [vmem:[%s2675_s7 + $0x88] sm:$0xff]   ;;  %v2332_v1 = vld [vmem:[%s2675_s7 + $0x80] sm:$0xff]  }
 0x715   : > { %2058 = vmatpush3.bf16.msra.mxu0 %v2307_v41  ;;  %2080 = vmatpush3.bf16.msra.mxu1 %v2308_v42  ;;  %v1253_v6 = vld [vmem:[%s577_s15] sm:$0xf] }
 0x716   : > { %2059 = vmatprep.subr.bf16.mxu0 %v2309_v43  ;;  %2081 = vmatprep.subr.bf16.mxu1 %v2310_v44  ;;  %v1258_v10 = vrot.slane %v1253_v6, %v1257_v4  ;;  %v1266_v12 = vrot.slane %v1253_v6, %v1265_v5  ;;  %v1262_v15 = vrot.slane %v1253_v6, %v1261_v7 }
 0x717   : > { %v1270_v16 = vrot.slane %v1253_v6, %v1269_v8 }
 0x719   : > { %2060 = vmatpush3.bf16.msra.mxu0 %v2311_v45  ;;  %2082 = vmatpush3.bf16.msra.mxu1 %v2312_v46 }
 0x71a   : > { %2061 = vmatprep.subr.bf16.mxu0 %v2313_v47  ;;  %2083 = vmatprep.subr.bf16.mxu1 %v2314_v48 }
 0x71d   : > { %2062 = vmatpush3.bf16.msra.mxu0 %v2315_v49  ;;  %2084 = vmatpush3.bf16.msra.mxu1 %v2316_v50 }
 0x71e   : > { %2063 = vmatprep.subr.bf16.mxu0 %v2317_v51  ;;  %2085 = vmatprep.subr.bf16.mxu1 %v2318_v52 }
 0x721   : > { %2064 = vmatpush3.bf16.msra.mxu0 %v2319_v53  ;;  %2086 = vmatpush3.bf16.msra.mxu1 %v2320_v54 }
 0x722   : > { %2065 = vmatprep.subr.bf16.mxu0 %v2321_v55  ;;  %2087 = vmatprep.subr.bf16.mxu1 %v2322_v56 }
 0x725   : > { %2066 = vmatpush3.bf16.msra.mxu0 %v2323_v57  ;;  %2088 = vmatpush3.bf16.msra.mxu1 %v2324_v58  ;;  %v1421_v57 = vld [vmem:[#allocation5] sm:$0xff] }
 0x726   : > { %2067 = vmatprep.subr.bf16.mxu0 %v2325_v59  ;;  %2089 = vmatprep.subr.bf16.mxu1 %v2326_v60 }
 0x729   : > { %2068 = vmatpush3.bf16.msra.mxu0 %v2327_v61  ;;  %2090 = vmatpush3.bf16.msra.mxu1 %v2328_v62 }
 0x72a   : > { %2069 = vmatprep.subr.bf16.mxu0 %v2329_v63  ;;  %2091 = vmatprep.subr.bf16.mxu1 %v2330_v9 }
 0x72d   : > { %2070 = vmatpush3.bf16.msra.mxu0 %v2331_v0  ;;  %2092 = vmatpush3.bf16.msra.mxu1 %v2332_v1 }
 0x7d0   : > { %v1353_v13 = vpop.f32.mrf.mxu0  ;;  %v1394_v14 = vpop.f32.mrf.mxu1 }
 0x7d1   : > { %v1354_v17 = vadd.f32 %v1353_v13, %v1258_v10  ;;  %v1395_v19 = vadd.f32 %v1394_v14, %v1266_v12 }
 0x7d2   : > { %v1355_v20 = vpop.f32.mrf.mxu0  ;;  %v1396_v11 = vpop.f32.mrf.mxu1 }
 0x7d3   : > { %v1405_v21 = vmul.f32 0.70710677, %v1354_v17  ;;  %v1407_v22 = vmul.f32 0.70710677, %v1395_v19  ;;  %v1356_v23 = vadd.f32 %v1355_v20, %v1262_v15  ;;  %v1397_v24 = vadd.f32 %v1396_v11, %v1270_v16 }
 0x7d4   : > { %v1357_v25 = vpop.f32.mrf.mxu0  ;;  %v1398_v26 = vpop.f32.mrf.mxu1  ;;  %v1401_v35 = vmul.f32 0.5, %v1354_v17  ;;  %v1403_v37 = vmul.f32 0.5, %v1395_v19 }
 0x7d5   : > { %2333 = verf.f32 %v1405_v21  ;;  %v1406_v27 = vmul.f32 0.70710677, %v1356_v23  ;;  %v1408_v29 = vmul.f32 0.70710677, %v1397_v24  ;;  %v1402_v38 = vmul.f32 0.5, %v1356_v23 }
 0x7d6   : > { %2335 = verf.f32 %v1407_v22  ;;  %v1358_v18 = vpop.f32.mrf.mxu0  ;;  %v1399_v28 = vpop.f32.mrf.mxu1  ;;  %v1404_v41 = vmul.f32 0.5, %v1397_v24 }
 0x7d7   : > { %2337 = verf.f32 %v1406_v27 }
 0x7d8   : > { %2339 = verf.f32 %v1408_v29 }
 0x7e2   : > { %v2334_v30 = vpop.eup %2333 }
 0x7e3   : > { %v2336_v31 = vpop.eup %2335  ;;  %v1413_v32 = vadd.f32 1.0, %v2334_v30 }
 0x7e4   : > { %v1415_v33 = vadd.f32 1.0, %v2336_v31  ;;  %v2338_v34 = vpop.eup %2337 }
 0x7e5   : > { %v2340_v36 = vpop.eup %2339  ;;  %v1414_v39 = vadd.f32 1.0, %v2338_v34  ;;  %v1417_v40 = vmul.f32 %v1413_v32, %v1401_v35 }
 0x7e6   : > { %v1416_v42 = vadd.f32 1.0, %v2340_v36  ;;  %v1419_v43 = vmul.f32 %v1415_v33, %v1403_v37 }
 0x7e7   : > { %v1418_v44 = vmul.f32 %v1414_v39, %v1402_v38  ;;  %v1422_v47 = vpack.c.bf16 %v1417_v40, %v1417_v40 }
 0x7e8   : > { %v1420_v45 = vmul.f32 %v1416_v42, %v1404_v41  ;;  %v1424_v49 = vpack.c.bf16 %v1419_v43, %v1419_v43 }
 0x7e9   : > { %v1423_v46 = vpack.c.bf16 %v1418_v44, %v1418_v44 }
 0x7ea   : > { %v1425_v48 = vpack.c.bf16 %v1420_v45, %v1420_v45 }
 0x7eb   : > { %1714 = vmatprep.mubr.bf16.mxu0 %v1423_v46 }
 0x7ec   : > { %1754 = vmatprep.mubr.bf16.mxu1 %v1425_v48  ;;  %1715 = vmatmul.mubr.bf16.vlgmr.msra.gmra.mxu0 %v1422_v47 }
 0x7ed   : > { %1755 = vmatmul.mubr.bf16.vlgmr.msra.gmra.mxu1 %v1424_v49 }
 0x8ac   : > { %v2071_v50 = vpop.f32.mrf.mxu0 }
 0x8ad   : > { %v2093_v51 = vpop.f32.mrf.mxu1 }
 0x8ae   : > { %v2072_v52 = vpop.f32.mrf.mxu0 }
 0x8af   : > { %v2073_v53 = vadd.f32 %v2072_v52, %v2071_v50  ;;  %v2094_v54 = vpop.f32.mrf.mxu1 }
 0x8b0   : > { %v2095_v55 = vadd.f32 %v2094_v54, %v2093_v51  ;;  %v2074_v56 = vpop.f32.mrf.mxu0 }
 0x8b1   : > { %v2096_v58 = vpop.f32.mrf.mxu1 }
 0x8b2   : > { %v1757_v59 = vadd.f32 %v2095_v55, %v2073_v53  ;;  %v2075_v60 = vpop.f32.mrf.mxu0  ;;  %1767 = sbr.rel (%p2021_p7) target bundleno = 2551 (0x9f7), region = 107 }
 0x8b3   : > { %v2097_v61 = vpop.f32.mrf.mxu1 }
 0x8b4   : > { %v1762_v62 = vadd.f32 %v1757_v59, %v1421_v57 }
 0x8b6   : > { %1763 = vst.msk [vmem:[#allocation5] sm:$0xff] %vm1315_vm9, %v1762_v62 }
 0x8b7   : > { %v2022_v9 = vld [vmem:[%s2959_s23] ss:$0 sm:$0xff] }
 0x8b8   : > { %v1777_v0 = vld [vmem:[#allocation2] sm:$0xff] }
 0x8b9   : > { %v2023_v15 = vld [vmem:[%s2960_s28] ss:$0 sm:$0xff] }
 0x8ba   : > { %v2024_v17 = vld [vmem:[%s2961_s24] ss:$0 sm:$0xff] }
 0x8bd   : > { %v1768_v63 = vld [vmem:[#allocation5] sm:$0xff] }
 0x8be   : > { %v1776_v1 = vadd.f32 %v2022_v9, %v1768_v63 }
 0x8c0   : > { %v1778_v2 = vadd.f32 %v1777_v0, %v1776_v1 }
 0x8c2   : > { %v1781_v3 = vsel %vm1315_vm9, %v1778_v2, 0.0 }
 0x8c3   : > { %1782 = vadd.xlane.f32.xlu0 %v1781_v3 }
 0x94c   : > { %v1783_v4 = vpop.xlane.xlu0 %1782 }
 0x94d   : > { %v1785_v5 = vmul.f32 0.03125, %v1783_v4 }
 0x94f   : > { %v1786_v6 = vsub.f32 %v1778_v2, %v1785_v5 }
 0x951   : > { %v1787_v7 = vmul.f32 %v1786_v6, %v1786_v6 }
 0x953   : > { %v1788_v8 = vsel %vm1315_vm9, %v1787_v7, 0.0 }
 0x954   : > { %1789 = vadd.xlane.f32.xlu0 %v1788_v8 }
 0x9dd   : > { %v1790_v10 = vpop.xlane.xlu0 %1789 }
 0x9de   : > { %v1791_v12 = vmul.f32 0.03125, %v1790_v10 }
 0x9e0   : > { %v1792_v13 = vadd.f32 1e-12, %v1791_v12 }
 0x9e2   : > { %2341 = vrsqrt.f32 %v1792_v13 }
 0x9ef   : > { %v2342_v14 = vpop.eup %2341 }
 0x9f0   : > { %v1794_v16 = vmul.f32 %v2342_v14, %v1786_v6 }
 0x9f2   : > { %v1801_v19 = vmul.f32 %v2023_v15, %v1794_v16 }
 0x9f4   : > { %v1808_v20 = vadd.f32 %v2024_v17, %v1801_v19 }
 0x9f6   : > { %1809 = vst.msk [vmem:[%s565_s8] sm:$0xff] %vm1315_vm9, %v1808_v20 }
 0x9f7 PF: > { %s2962_s16 = sld [smem:[#allocation11_spill]]  ;;  %s2026_s21 = sshll.u32 %s2439_s19, 7 }
 0x9f8   : > { %s2964_s14 = sld [smem:[#allocation28_spill]]  ;;  %s1824_s12 = sshll.u32 %s565_s8, 4  ;;  %s1825_s12 = int_to_ptr.vmem [resolvable:$true] %s1824_s12 }
 0x9f9   : > { %s2343_s7 = scalar_lea.vmem %s1825_s12, 128  ;;  %s2470_s15 = smov [#allocation7]  }
 0x9fa   : > { %p2344_p8 = scmp.ne.s32.totalorder %s1825_s12, %s2343_s7  ;;  %s2347_s23 = sshll.u32 %s2470_s15, 4  ;;  %s2348_s23 = int_to_ptr.vmem [resolvable:$false] %s2347_s23 }
 0x9fb   : > { %s2349_s18 = scalar_lea.vmem %s2348_s23, 256  ;;  %p2350_p13 = scmp.lt.s32.totalorder %s1825_s12, %s2348_s23 }
 0x9fc   : > { %p2345_p9 = pnand %p2344_p8, %p2625_p10  ;;  %p2351_p0 = scmp.lt.s32.totalorder %s2349_s18, %s2343_s7 }
 0x9fd   : > { %s2965_s30 = sand.u32 1, %s2962_s16  }
 0x9fe   : > { %s1822_s29 = scalar_lea.hbm %s2964_s14, %s2026_s21  ;;  %s1811_s22 = scalar_lea.sflag [#allocation8], %s2965_s30 }
 0x9ff   : > { %p2346_p11 = pneg %p2345_p9  ;;  %p2352_p1 = por %p2351_p0, %p2350_p13 }
 0xa01   : > { %p2353_p2 = pnand %p2352_p1, %p2346_p11 }
 0xa03   : > { %2356 = shalt.err (!%p2353_p2)
}
 0xa04   : > { %s2357_s19 = scalar_lea.hbm %s1822_s29, 128  ;;  %s2361_s25 = scalar_lea.hbm %s2964_s14, 256 }
 0xa05   : > { %p2358_p3 = scmp.ne.s32.totalorder %s1822_s29, %s2357_s19  ;;  %p2362_p6 = scmp.lt.s32.totalorder %s1822_s29, %s2964_s14 }
 0xa06   : > { %p2363_p7 = scmp.lt.s32.totalorder %s2361_s25, %s2357_s19 }
 0xa07   : > { %p2359_p4 = pnand %p2358_p3, %p2625_p10 }
 0xa08   : > { %p2364_p8 = por %p2363_p7, %p2362_p6 }
 0xa09   : > { %p2360_p5 = pneg %p2359_p4 }
 0xa0b   : > { %p2365_p9 = pnand %p2364_p8, %p2360_p5 }
 0xa0d   : > { %2368 = shalt.err (!%p2365_p9)
}
 0xa0e   : > { %2163 = dma.vmem_to_hbm [thread:$0]  (%p2625_p10), %s1825_s12, 128, %s1822_s29, %s1811_s22  }
 0xa0f PF: > { %s2966_s27 = sld [smem:[#allocation16_spill]] }
 0xa10   : > { %s2967_s24 = sld [smem:[#allocation10_spill]] }
 0xa15   : > { %p2169_p11 = scmp.ge.s32.totalorder %s2966_s27, 2 }
 0xa16   : > { %s1836_s21 = sand.u32 1, %s2967_s24  }
 0xa17   : > { %p2166_p13 = pnand %p2169_p11, %p2632_p12  ;;  %s1837_s17 = scalar_lea.sflag [#allocation8], %s1836_s21 }
 0xa19   : > { %p2167_p0 = pneg %p2166_p13 }
 0xa1b   : > { %2410 = dma.done.wait (%p2167_p0), %s1837_s17, 128  }
 0xa1c   : > { %2412 = vsyncadd (%p2167_p0), %s1837_s17, 4294967168  ;;  %s27_s22 = sadd.s32 1, %s2966_s27   ;;  %s2969_s29 = sld [smem:[#allocation11_spill]] }
 0xa1d   : > { %p24_p1 = scmp.ge.s32.totalorder %s27_s22, 6   ;;  %s2970_s30 = sld [smem:[#allocation12_spill]] }
 0xa1e   : > { %s2971_s15 = sld [smem:[#allocation21_spill]] }
 0xa1f   : > { %s2972_s16 = sld [smem:[#allocation13_spill]] }
 0xa20   : > { %s2973_s17 = sld [smem:[#allocation19_spill]]  ;;  %26 = sbr.rel (!%p24_p1) target bundleno = 13 (0xd), region = 159 }
 0xa21   : > { %s2974_s18 = sld [smem:[#allocation14_spill]] }
 0xa22   : > { %s2975_s19 = sld [smem:[#allocation15_spill]] }
 0xa23   : > { %s2976_s20 = sld [smem:[#allocation17_spill]] }
 0xa24   : > { %s2977_s21 = sld [smem:[#allocation18_spill]] }
 0xa25   :  { %1842 = vsyncpa [#allocation8], 1 }
 0xa26   :  { %1844 = vsyncpa [#allocation8 + $0x1], 1 }

</bundles_post_ra>
